<compile_context>
chip_gen: v5e
topology: v5e:2x2
jax: 0.10.0
libtpu: 0.0.40
codegen_flags: <defaults>
</compile_context>

<pallas_src>
import math
import functools

import jax
import jax.numpy as jnp
from jax.experimental import pallas as pl
from jax.experimental.pallas import tpu as pltpu

_BN_EPS = 1e-5
_LANE = 128


def _round_up(n, m):
    return ((n + m - 1) // m) * m


# ----------------------------- kernel ---------------------------------------


def _linear_bn(h_in, w_bf16, gamma, beta, *, relu):
    """Linear (no bias, cancelled by BN) -> BatchNorm1d (batch stats) -> optional ReLU."""
    # MXU path: bf16 operands, f32 accumulation.
    h = jnp.dot(h_in.astype(jnp.bfloat16), w_bf16,
                preferred_element_type=jnp.float32)                 # (N, C) f32
    inv_n = 1.0 / h.shape[0]
    mean = jnp.sum(h, axis=0, keepdims=True) * inv_n                # (1, C)
    var = jnp.sum(h * h, axis=0, keepdims=True) * inv_n - mean * mean
    var = jnp.maximum(var, 0.0)                                     # guard fp round-off
    scale = gamma * jax.lax.rsqrt(var + _BN_EPS)                    # (1, C), EUP rsqrt
    shift = beta - mean * scale
    h = h * scale + shift                                           # fused BN affine
    if relu:
        h = jnp.maximum(h, 0.0)
    return h


def _proj_mlp_kernel(x_ref,
                     w1_ref, g1_ref, b1_ref,
                     w2_ref, g2_ref, b2_ref,
                     w3_ref, g3_ref, b3_ref,
                     o_ref):
    x = x_ref[0]                                                    # (N, Cp_in) f32
    h = _linear_bn(x, w1_ref[...], g1_ref[...], b1_ref[...], relu=True)
    h = _linear_bn(h, w2_ref[...], g2_ref[...], b2_ref[...], relu=True)
    h = _linear_bn(h, w3_ref[...], g3_ref[...], b3_ref[...], relu=False)
    o_ref[0] = h.astype(o_ref.dtype)


# ----------------------------- wrapper ---------------------------------------


def pack_params(params_f32):
    """From PyTorch-style f32 params [w, b, gamma, beta] x 3 (w as (C_in, C_out)):
    drop the Linear biases (cancelled by BN mean subtraction), zero-pad channel
    dims to multiples of 128 (lane-dense), and store weights as bf16."""
    packed = []
    for i in range(3):
        w, _b, g, be = params_f32[4 * i: 4 * i + 4]
        ci, co = w.shape
        cpi, cpo = _round_up(ci, _LANE), _round_up(co, _LANE)
        wp = jnp.zeros((cpi, cpo), jnp.bfloat16).at[:ci, :co].set(w.astype(jnp.bfloat16))
        gp = jnp.zeros((1, cpo), jnp.float32).at[:, :co].set(g.reshape(1, -1))
        bp = jnp.zeros((1, cpo), jnp.float32).at[:, :co].set(be.reshape(1, -1))
        packed += [wp, gp, bp]
    return packed


@functools.partial(jax.jit, static_argnames=("out_channels",))
def proj_mlp(x, packed_params, *, out_channels):
    """x: (N, C_in) or (B, N, C_in) float32.  BatchNorm stats are computed over
    axis N independently per leading batch instance (== calling the module once
    per instance in train mode)."""
    squeeze = (x.ndim == 2)
    if squeeze:
        x = x[None]
    B, N, c_in = x.shape
    cp_in = packed_params[0].shape[0]
    cp_out = packed_params[-3].shape[1]

    # Zero-pad input channels to the lane-dense padded width.
    xp = jnp.zeros((B, N, cp_in), jnp.float32).at[:, :, :c_in].set(x)

    x_spec = pl.BlockSpec((1, N, cp_in), lambda b: (b, 0, 0))
    # Constant index_map -> weights/gamma/beta stay VMEM-resident across grid steps.
    w_specs = [pl.BlockSpec(p.shape, lambda b: (0, 0)) for p in packed_params]
    out_spec = pl.BlockSpec((1, N, cp_out), lambda b: (b, 0, 0))

    out = pl.pallas_call(
        _proj_mlp_kernel,
        out_shape=jax.ShapeDtypeStruct((B, N, cp_out), jnp.float32),
        grid=(B,),
        in_specs=[x_spec] + w_specs,
        out_specs=out_spec,
        compiler_params=pltpu.CompilerParams(
            dimension_semantics=("parallel",)),   # shards across TCs on v7x
    )(xp, *packed_params)

    out = out[:, :, :out_channels]
    return out[0] if squeeze else out


# ----------------------------- init & references -----------------------------


def init_params(key, in_channels, hidden_channels, out_channels):
    """PyTorch-style init: Linear weight/bias ~ U(-1/sqrt(fan_in), 1/sqrt(fan_in)),
    BN weight = 1, bias = 0.  Weights stored as (C_in, C_out)."""
    dims = [(in_channels, hidden_channels),
            (hidden_channels, hidden_channels),
            (hidden_channels, out_channels)]
    params = []
    for fan_in, fan_out in dims:
        key, kw, kb = jax.random.split(key, 3)
        bound = 1.0 / math.sqrt(fan_in)
        w = jax.random.uniform(kw, (fan_in, fan_out), jnp.float32, -bound, bound)
        b = jax.random.uniform(kb, (1, fan_out), jnp.float32, -bound, bound)
        params += [w, b,
                   jnp.ones((1, fan_out), jnp.float32),
                   jnp.zeros((1, fan_out), jnp.float32)]
    return params


def proj_mlp_ref_f32(x, params_f32):
    """PyTorch-faithful f32 reference (includes Linear biases, centered biased var)."""
    h = x
    for i in range(3):
        w, b, g, be = params_f32[4 * i: 4 * i + 4]
        h = h @ w + b
        mean = jnp.mean(h, axis=0, keepdims=True)
        var = jnp.mean((h - mean) ** 2, axis=0, keepdims=True)
        h = (h - mean) * jax.lax.rsqrt(var + _BN_EPS) * g + be
        if i < 2:
            h = jnp.maximum(h, 0.0)
    return h


def proj_mlp_ref_bf16(x, params_f32):
    """Same math path as the kernel (bf16 matmul, no bias, fused BN affine)."""
    h = x
    for i in range(3):
        w, _b, g, be = params_f32[4 * i: 4 * i + 4]
        h = jnp.dot(h.astype(jnp.bfloat16), w.astype(jnp.bfloat16),
                    preferred_element_type=jnp.float32)
        inv_n = 1.0 / h.shape[0]
        mean = jnp.sum(h, axis=0, keepdims=True) * inv_n
        var = jnp.maximum(jnp.sum(h * h, axis=0, keepdims=True) * inv_n - mean * mean, 0.0)
        scale = g * jax.lax.rsqrt(var + _BN_EPS)
        h = h * scale + (be - mean * scale)
        if i < 2:
            h = jnp.maximum(h, 0.0)
    return h


# ----------------------------- demo / test ------------------------------------

if __name__ == "__main__":
    # Small shapes consistent with the module (Linear sees (N, C_in)).  Channel
    # dims are deliberately NOT multiples of 128 to exercise the padding path.
    B, N = 2, 64
    C_IN, C_HID, C_OUT = 96, 192, 80

    key = jax.random.PRNGKey(0)
    key, kx = jax.random.split(key)
    x = jax.random.normal(kx, (B, N, C_IN), jnp.float32)

    params = init_params(key, C_IN, C_HID, C_OUT)   # f32 PyTorch-style (with biases)
    packed = pack_params(params)                    # bf16 lane-padded, biases dropped

    out = proj_mlp(x, packed, out_channels=C_OUT)
    out = jax.block_until_ready(out)
    assert out.shape == (B, N, C_OUT)

    # Tight check: kernel implements exactly the intended bf16-matmul math path.
    ref_exact = jnp.stack([proj_mlp_ref_bf16(x[b], params) for b in range(B)])
    assert jnp.allclose(out, ref_exact, atol=1e-3, rtol=1e-3), "mismatch vs bf16-path reference"

    # Semantics check: matches the true f32 PyTorch module (Linear bias included,
    # train-mode BatchNorm1d) up to bf16 matmul precision.
    ref_true = jnp.stack([proj_mlp_ref_f32(x[b], params) for b in range(B)])
    rel = jnp.linalg.norm(out - ref_true) / jnp.linalg.norm(ref_true)
    assert rel < 3e-2, f"relative error vs f32 reference too large: {rel}"

    # 2-D (single instance) interface matches the batched path.
    out_single = jax.block_until_ready(proj_mlp(x[0], packed, out_channels=C_OUT))
    assert jnp.allclose(out_single, out[0], atol=1e-4, rtol=1e-4)

    print("KERNEL_OK")
</pallas_src>

<mosaic_0001>
module attributes {stable_mosaic.version = 11 : i64} {
  func.func @_proj_mlp_kernel(%arg0: i32, %arg1: memref<1x64x128xf32, #tpu.memory_space<vmem>>, %arg2: memref<128x256xbf16, #tpu.memory_space<vmem>>, %arg3: memref<1x256xf32, #tpu.memory_space<vmem>>, %arg4: memref<1x256xf32, #tpu.memory_space<vmem>>, %arg5: memref<256x256xbf16, #tpu.memory_space<vmem>>, %arg6: memref<1x256xf32, #tpu.memory_space<vmem>>, %arg7: memref<1x256xf32, #tpu.memory_space<vmem>>, %arg8: memref<256x128xbf16, #tpu.memory_space<vmem>>, %arg9: memref<1x128xf32, #tpu.memory_space<vmem>>, %arg10: memref<1x128xf32, #tpu.memory_space<vmem>>, %arg11: memref<1x64x128xf32, #tpu.memory_space<vmem>>) attributes {dimension_semantics = [#tpu.dimension_semantics<parallel>], iteration_bounds = array<i64: 2>, scalar_prefetch = 0 : i64, scratch_operands = 0 : i64, tpu.core_type = #tpu.core_type<tc>, window_params = [{transform_indices = @transform_0, window_bounds = array<i64: 1, 64, 128>}, {pipeline_mode = #tpu.pipeline_mode<synchronous>, transform_indices = @transform_1, window_bounds = array<i64: 128, 256>}, {pipeline_mode = #tpu.pipeline_mode<synchronous>, transform_indices = @transform_2, window_bounds = array<i64: 1, 256>}, {pipeline_mode = #tpu.pipeline_mode<synchronous>, transform_indices = @transform_3, window_bounds = array<i64: 1, 256>}, {pipeline_mode = #tpu.pipeline_mode<synchronous>, transform_indices = @transform_4, window_bounds = array<i64: 256, 256>}, {pipeline_mode = #tpu.pipeline_mode<synchronous>, transform_indices = @transform_5, window_bounds = array<i64: 1, 256>}, {pipeline_mode = #tpu.pipeline_mode<synchronous>, transform_indices = @transform_6, window_bounds = array<i64: 1, 256>}, {pipeline_mode = #tpu.pipeline_mode<synchronous>, transform_indices = @transform_7, window_bounds = array<i64: 256, 128>}, {pipeline_mode = #tpu.pipeline_mode<synchronous>, transform_indices = @transform_8, window_bounds = array<i64: 1, 128>}, {pipeline_mode = #tpu.pipeline_mode<synchronous>, transform_indices = @transform_9, window_bounds = array<i64: 1, 128>}, {transform_indices = @transform_10, window_bounds = array<i64: 1, 64, 128>}]} {
    %c0 = arith.constant 0 : index
    %c0_0 = arith.constant 0 : index
    %c0_1 = arith.constant 0 : index
    %0 = vector.load %arg1[%c0, %c0_0, %c0_1] : memref<1x64x128xf32, #tpu.memory_space<vmem>>, vector<1x64x128xf32>
    %1 = vector.shape_cast %0 : vector<1x64x128xf32> to vector<64x128xf32>
    %c0_2 = arith.constant 0 : index
    %c0_3 = arith.constant 0 : index
    %2 = vector.load %arg2[%c0_2, %c0_3] : memref<128x256xbf16, #tpu.memory_space<vmem>>, vector<128x256xbf16>
    %c0_4 = arith.constant 0 : index
    %c0_5 = arith.constant 0 : index
    %3 = vector.load %arg3[%c0_4, %c0_5] : memref<1x256xf32, #tpu.memory_space<vmem>>, vector<1x256xf32>
    %c0_6 = arith.constant 0 : index
    %c0_7 = arith.constant 0 : index
    %4 = vector.load %arg4[%c0_6, %c0_7] : memref<1x256xf32, #tpu.memory_space<vmem>>, vector<1x256xf32>
    %5 = arith.truncf %1 : vector<64x128xf32> to vector<64x128xbf16>
    %cst = arith.constant dense<0.000000e+00> : vector<64x256xf32>
    %6 = tpu.matmul %5, %2, %cst {dimension_numbers = #tpu.dot_dimension_numbers<[1], [0], [0], [1], [0, 0, 1, 1], [], []>} : vector<64x128xbf16>, vector<128x256xbf16>, vector<64x256xf32> -> vector<64x256xf32>
    %cst_8 = arith.constant dense<0.000000e+00> : vector<256xf32>
    %7 = vector.multi_reduction <add>, %6, %cst_8 [0] : vector<64x256xf32> to vector<256xf32>
    %8 = vector.shape_cast %7 : vector<256xf32> to vector<1x256xf32>
    %cst_9 = arith.constant 1.562500e-02 : f32
    %9 = vector.broadcast %cst_9 : f32 to vector<1x256xf32>
    %10 = arith.mulf %8, %9 : vector<1x256xf32>
    %11 = arith.mulf %6, %6 : vector<64x256xf32>
    %cst_10 = arith.constant dense<0.000000e+00> : vector<256xf32>
    %12 = vector.multi_reduction <add>, %11, %cst_10 [0] : vector<64x256xf32> to vector<256xf32>
    %13 = vector.shape_cast %12 : vector<256xf32> to vector<1x256xf32>
    %cst_11 = arith.constant 1.562500e-02 : f32
    %14 = vector.broadcast %cst_11 : f32 to vector<1x256xf32>
    %15 = arith.mulf %13, %14 : vector<1x256xf32>
    %16 = arith.mulf %10, %10 : vector<1x256xf32>
    %17 = arith.subf %15, %16 : vector<1x256xf32>
    %cst_12 = arith.constant 0.000000e+00 : f32
    %18 = vector.broadcast %cst_12 : f32 to vector<1x256xf32>
    %19 = arith.maximumf %17, %18 : vector<1x256xf32>
    %cst_13 = arith.constant 9.99999974E-6 : f32
    %20 = vector.broadcast %cst_13 : f32 to vector<1x256xf32>
    %21 = arith.addf %19, %20 : vector<1x256xf32>
    %22 = math.rsqrt %21 : vector<1x256xf32>
    %23 = arith.mulf %3, %22 : vector<1x256xf32>
    %24 = arith.mulf %10, %23 : vector<1x256xf32>
    %25 = arith.subf %4, %24 : vector<1x256xf32>
    %26 = vector.broadcast %23 : vector<1x256xf32> to vector<64x256xf32>
    %27 = arith.mulf %6, %26 : vector<64x256xf32>
    %28 = vector.broadcast %25 : vector<1x256xf32> to vector<64x256xf32>
    %29 = arith.addf %27, %28 : vector<64x256xf32>
    %cst_14 = arith.constant 0.000000e+00 : f32
    %30 = vector.broadcast %cst_14 : f32 to vector<64x256xf32>
    %31 = arith.maximumf %29, %30 : vector<64x256xf32>
    %c0_15 = arith.constant 0 : index
    %c0_16 = arith.constant 0 : index
    %32 = vector.load %arg5[%c0_15, %c0_16] : memref<256x256xbf16, #tpu.memory_space<vmem>>, vector<256x256xbf16>
    %c0_17 = arith.constant 0 : index
    %c0_18 = arith.constant 0 : index
    %33 = vector.load %arg6[%c0_17, %c0_18] : memref<1x256xf32, #tpu.memory_space<vmem>>, vector<1x256xf32>
    %c0_19 = arith.constant 0 : index
    %c0_20 = arith.constant 0 : index
    %34 = vector.load %arg7[%c0_19, %c0_20] : memref<1x256xf32, #tpu.memory_space<vmem>>, vector<1x256xf32>
    %35 = arith.truncf %31 : vector<64x256xf32> to vector<64x256xbf16>
    %cst_21 = arith.constant dense<0.000000e+00> : vector<64x256xf32>
    %36 = tpu.matmul %35, %32, %cst_21 {dimension_numbers = #tpu.dot_dimension_numbers<[1], [0], [0], [1], [0, 0, 1, 1], [], []>} : vector<64x256xbf16>, vector<256x256xbf16>, vector<64x256xf32> -> vector<64x256xf32>
    %cst_22 = arith.constant dense<0.000000e+00> : vector<256xf32>
    %37 = vector.multi_reduction <add>, %36, %cst_22 [0] : vector<64x256xf32> to vector<256xf32>
    %38 = vector.shape_cast %37 : vector<256xf32> to vector<1x256xf32>
    %cst_23 = arith.constant 1.562500e-02 : f32
    %39 = vector.broadcast %cst_23 : f32 to vector<1x256xf32>
    %40 = arith.mulf %38, %39 : vector<1x256xf32>
    %41 = arith.mulf %36, %36 : vector<64x256xf32>
    %cst_24 = arith.constant dense<0.000000e+00> : vector<256xf32>
    %42 = vector.multi_reduction <add>, %41, %cst_24 [0] : vector<64x256xf32> to vector<256xf32>
    %43 = vector.shape_cast %42 : vector<256xf32> to vector<1x256xf32>
    %cst_25 = arith.constant 1.562500e-02 : f32
    %44 = vector.broadcast %cst_25 : f32 to vector<1x256xf32>
    %45 = arith.mulf %43, %44 : vector<1x256xf32>
    %46 = arith.mulf %40, %40 : vector<1x256xf32>
    %47 = arith.subf %45, %46 : vector<1x256xf32>
    %cst_26 = arith.constant 0.000000e+00 : f32
    %48 = vector.broadcast %cst_26 : f32 to vector<1x256xf32>
    %49 = arith.maximumf %47, %48 : vector<1x256xf32>
    %cst_27 = arith.constant 9.99999974E-6 : f32
    %50 = vector.broadcast %cst_27 : f32 to vector<1x256xf32>
    %51 = arith.addf %49, %50 : vector<1x256xf32>
    %52 = math.rsqrt %51 : vector<1x256xf32>
    %53 = arith.mulf %33, %52 : vector<1x256xf32>
    %54 = arith.mulf %40, %53 : vector<1x256xf32>
    %55 = arith.subf %34, %54 : vector<1x256xf32>
    %56 = vector.broadcast %53 : vector<1x256xf32> to vector<64x256xf32>
    %57 = arith.mulf %36, %56 : vector<64x256xf32>
    %58 = vector.broadcast %55 : vector<1x256xf32> to vector<64x256xf32>
    %59 = arith.addf %57, %58 : vector<64x256xf32>
    %cst_28 = arith.constant 0.000000e+00 : f32
    %60 = vector.broadcast %cst_28 : f32 to vector<64x256xf32>
    %61 = arith.maximumf %59, %60 : vector<64x256xf32>
    %c0_29 = arith.constant 0 : index
    %c0_30 = arith.constant 0 : index
    %62 = vector.load %arg8[%c0_29, %c0_30] : memref<256x128xbf16, #tpu.memory_space<vmem>>, vector<256x128xbf16>
    %c0_31 = arith.constant 0 : index
    %c0_32 = arith.constant 0 : index
    %63 = vector.load %arg9[%c0_31, %c0_32] : memref<1x128xf32, #tpu.memory_space<vmem>>, vector<1x128xf32>
    %c0_33 = arith.constant 0 : index
    %c0_34 = arith.constant 0 : index
    %64 = vector.load %arg10[%c0_33, %c0_34] : memref<1x128xf32, #tpu.memory_space<vmem>>, vector<1x128xf32>
    %65 = arith.truncf %61 : vector<64x256xf32> to vector<64x256xbf16>
    %cst_35 = arith.constant dense<0.000000e+00> : vector<64x128xf32>
    %66 = tpu.matmul %65, %62, %cst_35 {dimension_numbers = #tpu.dot_dimension_numbers<[1], [0], [0], [1], [0, 0, 1, 1], [], []>} : vector<64x256xbf16>, vector<256x128xbf16>, vector<64x128xf32> -> vector<64x128xf32>
    %cst_36 = arith.constant dense<0.000000e+00> : vector<128xf32>
    %67 = vector.multi_reduction <add>, %66, %cst_36 [0] : vector<64x128xf32> to vector<128xf32>
    %68 = vector.shape_cast %67 : vector<128xf32> to vector<1x128xf32>
    %cst_37 = arith.constant 1.562500e-02 : f32
    %69 = vector.broadcast %cst_37 : f32 to vector<1x128xf32>
    %70 = arith.mulf %68, %69 : vector<1x128xf32>
    %71 = arith.mulf %66, %66 : vector<64x128xf32>
    %cst_38 = arith.constant dense<0.000000e+00> : vector<128xf32>
    %72 = vector.multi_reduction <add>, %71, %cst_38 [0] : vector<64x128xf32> to vector<128xf32>
    %73 = vector.shape_cast %72 : vector<128xf32> to vector<1x128xf32>
    %cst_39 = arith.constant 1.562500e-02 : f32
    %74 = vector.broadcast %cst_39 : f32 to vector<1x128xf32>
    %75 = arith.mulf %73, %74 : vector<1x128xf32>
    %76 = arith.mulf %70, %70 : vector<1x128xf32>
    %77 = arith.subf %75, %76 : vector<1x128xf32>
    %cst_40 = arith.constant 0.000000e+00 : f32
    %78 = vector.broadcast %cst_40 : f32 to vector<1x128xf32>
    %79 = arith.maximumf %77, %78 : vector<1x128xf32>
    %cst_41 = arith.constant 9.99999974E-6 : f32
    %80 = vector.broadcast %cst_41 : f32 to vector<1x128xf32>
    %81 = arith.addf %79, %80 : vector<1x128xf32>
    %82 = math.rsqrt %81 : vector<1x128xf32>
    %83 = arith.mulf %63, %82 : vector<1x128xf32>
    %84 = arith.mulf %70, %83 : vector<1x128xf32>
    %85 = arith.subf %64, %84 : vector<1x128xf32>
    %86 = vector.broadcast %83 : vector<1x128xf32> to vector<64x128xf32>
    %87 = arith.mulf %66, %86 : vector<64x128xf32>
    %88 = vector.broadcast %85 : vector<1x128xf32> to vector<64x128xf32>
    %89 = arith.addf %87, %88 : vector<64x128xf32>
    %c0_42 = arith.constant 0 : index
    %c0_43 = arith.constant 0 : index
    %c0_44 = arith.constant 0 : index
    %90 = vector.load %arg11[%c0_42, %c0_43, %c0_44] : memref<1x64x128xf32, #tpu.memory_space<vmem>>, vector<1x64x128xf32>
    %91 = vector.shape_cast %90 : vector<1x64x128xf32> to vector<64x128xf32>
    %92 = vector.shape_cast %89 : vector<64x128xf32> to vector<1x64x128xf32>
    tpu.vector_store %arg11[%c0_42, %c0_43, %c0_44], %92 {strides = array<i32>} : memref<1x64x128xf32, #tpu.memory_space<vmem>>, vector<1x64x128xf32>,
    return
  }
  func.func @transform_0(%arg0: i32) -> (i32, i32, i32) {
    %c0_i32 = arith.constant 0 : i32
    %c0_i32_0 = arith.constant 0 : i32
    %c0_i32_1 = arith.constant 0 : i32
    return %arg0, %c0_i32, %c0_i32_0 : i32, i32, i32
  }
  func.func @transform_1(%arg0: i32) -> (i32, i32) {
    %c0_i32 = arith.constant 0 : i32
    %c0_i32_0 = arith.constant 0 : i32
    %c0_i32_1 = arith.constant 0 : i32
    return %c0_i32, %c0_i32_0 : i32, i32
  }
  func.func @transform_2(%arg0: i32) -> (i32, i32) {
    %c0_i32 = arith.constant 0 : i32
    %c0_i32_0 = arith.constant 0 : i32
    %c0_i32_1 = arith.constant 0 : i32
    return %c0_i32, %c0_i32_0 : i32, i32
  }
  func.func @transform_3(%arg0: i32) -> (i32, i32) {
    %c0_i32 = arith.constant 0 : i32
    %c0_i32_0 = arith.constant 0 : i32
    %c0_i32_1 = arith.constant 0 : i32
    return %c0_i32, %c0_i32_0 : i32, i32
  }
  func.func @transform_4(%arg0: i32) -> (i32, i32) {
    %c0_i32 = arith.constant 0 : i32
    %c0_i32_0 = arith.constant 0 : i32
    %c0_i32_1 = arith.constant 0 : i32
    return %c0_i32, %c0_i32_0 : i32, i32
  }
  func.func @transform_5(%arg0: i32) -> (i32, i32) {
    %c0_i32 = arith.constant 0 : i32
    %c0_i32_0 = arith.constant 0 : i32
    %c0_i32_1 = arith.constant 0 : i32
    return %c0_i32, %c0_i32_0 : i32, i32
  }
  func.func @transform_6(%arg0: i32) -> (i32, i32) {
    %c0_i32 = arith.constant 0 : i32
    %c0_i32_0 = arith.constant 0 : i32
    %c0_i32_1 = arith.constant 0 : i32
    return %c0_i32, %c0_i32_0 : i32, i32
  }
  func.func @transform_7(%arg0: i32) -> (i32, i32) {
    %c0_i32 = arith.constant 0 : i32
    %c0_i32_0 = arith.constant 0 : i32
    %c0_i32_1 = arith.constant 0 : i32
    return %c0_i32, %c0_i32_0 : i32, i32
  }
  func.func @transform_8(%arg0: i32) -> (i32, i32) {
    %c0_i32 = arith.constant 0 : i32
    %c0_i32_0 = arith.constant 0 : i32
    %c0_i32_1 = arith.constant 0 : i32
    return %c0_i32, %c0_i32_0 : i32, i32
  }
  func.func @transform_9(%arg0: i32) -> (i32, i32) {
    %c0_i32 = arith.constant 0 : i32
    %c0_i32_0 = arith.constant 0 : i32
    %c0_i32_1 = arith.constant 0 : i32
    return %c0_i32, %c0_i32_0 : i32, i32
  }
  func.func @transform_10(%arg0: i32) -> (i32, i32, i32) {
    %c0_i32 = arith.constant 0 : i32
    %c0_i32_0 = arith.constant 0 : i32
    %c0_i32_1 = arith.constant 0 : i32
    return %arg0, %c0_i32, %c0_i32_0 : i32, i32, i32
  }
}

</mosaic_0001>

<bundles_post_ra>
// kernel: proj_mlp.1
= control target key start
LH: loop header
LB: loop body
LE: loop exit
PB: predicated region body
PF: predicated region fallthrough
CT: control target
= control target key end

     0   :  { %s2969_s0 = inlined_call_operand.vmem [shape: f32[2,64,128], index: 0, kind: input, shape index: {}]   ;;  %s2970_s1 = inlined_call_operand.hbm [shape: bf16[128,256], index: 1, kind: input, shape index: {}]   ;;  %s2971_s2 = inlined_call_operand.vmem [shape: f32[1,256], index: 2, kind: input, shape index: {}]   ;;  %s2972_s3 = inlined_call_operand.vmem [shape: f32[1,256], index: 3, kind: input, shape index: {}]   ;;  %s2973_s4 = inlined_call_operand.vmem [shape: bf16[256,256], index: 4, kind: input, shape index: {}]   ;;  %s2974_s5 = inlined_call_operand.hbm [shape: f32[1,256], index: 5, kind: input, shape index: {}]   ;;  %s2975_s6 = inlined_call_operand.vmem [shape: f32[1,256], index: 6, kind: input, shape index: {}]   ;;  %s2976_s7 = inlined_call_operand.hbm [shape: bf16[256,128], index: 7, kind: input, shape index: {}]   ;;  %s2977_s8 = inlined_call_operand.hbm [shape: f32[1,128], index: 8, kind: input, shape index: {}]   ;;  %s2978_s9 = inlined_call_operand.vmem [shape: f32[1,128], index: 9, kind: input, shape index: {}]   ;;  %s2979_s10 = inlined_call_operand.hbm [shape: f32[2,64,128], index: 10, kind: output, shape index: {}]  }
   0x1   :  { %2985 = sst [smem:[#allocation20_spill]] %s2970_s1 }
   0x2   :  { %2986 = sst [smem:[#allocation21_spill]] %s2974_s5 }
   0x3   :  { %15 = vsyncpa [#allocation3], 0 }
   0x4   :  { %16 = vsyncpa [#allocation6], 0 }
   0x5   :  { %17 = vsyncpa [#allocation9], 0 }
   0x6   :  { %18 = vsyncpa [#allocation4], 0 }
   0x7   :  { %20 = vsyncpa [#allocation4 + $0x1], 0  ;;  %s2349_s13 = smov 0   ;;  %s2351_s14 = smov 0  }
   0x8   :  { %s2353_s15 = smov 0   ;;  %s2355_s16 = smov 0  }
   0x9 LB: > { %2987 = sst [smem:[#allocation15_spill]] %s2270_s13  ;;  %s2370_s17 = sadd.s32 4294967295, %s2282_s16   ;;  %s2282_s16 = sphi %s2355_s16, %s3000_s16   ;;  %s2278_s15 = sphi %s2353_s15, %s3002_s15   ;;  %s2274_s14 = sphi %s2351_s14, %s3004_s14   ;;  %s2270_s13 = sphi %s2349_s13, %s3003_s13  }
   0xa   : > { %2988 = sst [smem:[#allocation16_spill]] %s2278_s15  ;;  %s1650_s18 = sadd.s32 4294967294, %s2282_s16  }
   0xb   : > { %s2374_s19 = sadd.s32 1, %s2282_s16   ;;  %s248_s20 = sadd.s32 1, %s2278_s15 }
   0xc   : > { %2989 = sst [smem:[#allocation17_spill]] %s2374_s19  ;;  %s245_s21 = ssub.s32 %s2282_s16, %s2374_s19 }
   0xd   : > { %p258_p0 = scmp.ne.s32.totalorder %s2278_s15, %s2274_s14  ;;  %p246_p1 = scmp.eq.s32.totalorder %s245_s21, 0 }
   0xe   : > { %p259_p2 = scmp.eq.s32.totalorder %s2370_s17, 1  ;;  %p264_p3 = scmp.ne.s32.totalorder %s2274_s14, %s2270_s13 }
   0xf   : > { %p265_p4 = scmp.eq.s32.totalorder %s1650_s18, 1  ;;  %p1651_p7 = scmp.ge.s32.totalorder %s2282_s16, 1 }
  0x10   : > { %s2385_s22 = scalar_select %p246_p1, %s2278_s15, %s248_s20  }
  0x11   : > { %p2387_p5 = por %p259_p2, %p258_p0  ;;  %p2391_p6 = por %p265_p4, %p264_p3 }
  0x12   : > { %2990 = sst [smem:[#allocation18_spill]] %s2385_s22  ;;  %p272_p8 = scmp.lt.s32.totalorder %s2282_s16, 3 }
  0x13   : > { %s2992_s24 = scalar_select %p2391_p6, 1, 0 }
  0x14   : > { %p2027_p9 = scmp.eq.s32.totalorder %s2370_s17, 0  ;;  %p2398_p10 = pnand %p1651_p7, %p272_p8 }
  0x15   : > { %2993 = sst [smem:[#allocation19_spill]] %s2992_s24  ;;  %s2284_s29 = smov [#allocation5]  }
  0x16   : > { %s2995_s5 = sld [smem:[#allocation21_spill]]  ;;  %p2010_p11 = pneg %p2398_p10 }
  0x17   : > { %s309_s30 = sshll.u32 %s2284_s29, 4  ;;  %s2996_s1 = sld [smem:[#allocation20_spill]]  ;;  %s310_s30 = int_to_ptr.vmem [resolvable:$true] %s309_s30 }
  0x18   : > { %p2412_p12 = pnand %p2027_p9, %p2010_p11  ;;  %s2285_s21 = smov [#allocation2]  }
  0x19   : > { %s285_s26 = sshll.u32 %s2285_s21, 4  ;;  %s2286_s27 = smov 128   ;;  %s286_s26 = int_to_ptr.vmem [resolvable:$true] %s285_s26 }
  0x1a   : > { %s2287_s29 = smov 8   ;;  %s336_s21 = sshll.u32 %s2977_s8, 4  ;;  %s337_s21 = int_to_ptr.hbm [resolvable:$true] %s336_s21 }
  0x1b   : > { %s2289_s24 = smov 64  }
  0x1c   : > { %s307_s28 = sshll.u32 %s2995_s5, 4  ;;  %s2288_s5 = smov [#allocation7]   ;;  %s308_s28 = int_to_ptr.hbm [resolvable:$true] %s307_s28 }
  0x1d   : > { %s283_s18 = sshll.u32 %s2996_s1, 4  ;;  %s321_s1 = sshll.u32 %s2976_s7, 4  ;;  %s284_s18 = int_to_ptr.hbm [resolvable:$true] %s283_s18  ;;  %s322_s1 = int_to_ptr.hbm [resolvable:$true] %s321_s1 }
  0x1e   : > { %2016 = dma.hbm_to_vmem [thread:$0]  (!%p2412_p12), %s308_s28, 32, %s310_s30, [#allocation6]  }
  0x1f   : > { %2013 = dma.hbm_to_vmem [thread:$0]  (!%p2412_p12), %s284_s18, 2048, %s286_s26, [#allocation3], %s2286_s27, %s2286_s27, %s2287_s29  }
  0x20   : > { %s323_s22 = sshll.u32 %s2288_s5, 4  ;;  %s2290_s28 = smov 4   ;;  %s324_s22 = int_to_ptr.vmem [resolvable:$true] %s323_s22 }
  0x21   : > { %2019 = dma.hbm_to_vmem [thread:$0]  (!%p2412_p12), %s322_s1, 2048, %s324_s22, [#allocation6], %s2289_s24, %s2289_s24, %s2290_s28  }
  0x22   : > { %s2291_s30 = smov [#allocation8]   ;;  %362 = sbr.rel (%p2398_p10) target bundleno = 830 (0x33e), region = 60 }
  0x23   : > { %s338_s13 = sshll.u32 %s2291_s30, 4  ;;  %s339_s13 = int_to_ptr.vmem [resolvable:$true] %s338_s13 }
  0x24   : > { %2022 = dma.hbm_to_vmem [thread:$0]  (!%p2412_p12), %s337_s21, 16, %s339_s13, [#allocation9]  }
  0x27   : > { %2253 = dma.done.wait (%p2027_p9), [#allocation3], 2048  }
  0x28   : > { %2255 = vsyncadd (%p2027_p9), [#allocation3], 4294965248 }
  0x29   : > { %2257 = dma.done.wait (%p2027_p9), [#allocation6], 2080  }
  0x2a   : > { %2259 = vsyncadd (%p2027_p9), [#allocation6], 4294965216 }
  0x2b   : > { %2261 = dma.done.wait (%p2027_p9), [#allocation9], 16  }
  0x2c   : > { %2263 = vsyncadd (%p2027_p9), [#allocation9], 4294967280  ;;  %v1723_v0 = vld [vmem:[#allocation2 + $0x70] sm:$0xf]  ;;  %v1942_v1 = vld [vmem:[#allocation2 + $0x74] sm:$0xf0] }
  0x2d   : > { %v1941_v2 = vld [vmem:[#allocation2 + $0x74] sm:$0xf]  ;;  %v1724_v3 = vor.u32 %v1942_v1, %v1723_v0  ;;  %v1725_v4 = vld [vmem:[#allocation2 + $0x78] sm:$0xf0]  ;;  %v1715_v5 = vld [vmem:[#allocation2 + $0x60] sm:$0xf] }
  0x2e   : > { %v1940_v6 = vld [vmem:[#allocation2 + $0x64] sm:$0xf0]  ;;  %v1728_v7 = vor.u32 %v1941_v2, %v1725_v4  ;;  %v1939_v8 = vld [vmem:[#allocation2 + $0x64] sm:$0xf]  ;;  %v1717_v9 = vld [vmem:[#allocation2 + $0x68] sm:$0xf0] }
  0x2f   : > { %531 = vmatpush.bf16.msra.mxu0 %v1724_v3  ;;  %v1716_v10 = vor.u32 %v1940_v6, %v1715_v5  ;;  %v1720_v11 = vor.u32 %v1939_v8, %v1717_v9  ;;  %v1707_v12 = vld [vmem:[#allocation2 + $0x50] sm:$0xf]  ;;  %v1938_v13 = vld [vmem:[#allocation2 + $0x54] sm:$0xf0]  ;;  %v1937_v14 = vld [vmem:[#allocation2 + $0x54] sm:$0xf] }
  0x30   : > { %560 = vmatpush.bf16.msra.mxu1 %v1728_v7  ;;  %v1709_v15 = vld [vmem:[#allocation2 + $0x58] sm:$0xf0]  ;;  %v1708_v16 = vor.u32 %v1938_v13, %v1707_v12  ;;  %v1699_v18 = vld [vmem:[#allocation2 + $0x40] sm:$0xf]  ;;  %v1936_v19 = vld [vmem:[#allocation2 + $0x44] sm:$0xf0] }
  0x31   : > { %v1712_v17 = vor.u32 %v1937_v14, %v1709_v15  ;;  %v1935_v20 = vld [vmem:[#allocation2 + $0x44] sm:$0xf]  ;;  %v1701_v21 = vld [vmem:[#allocation2 + $0x48] sm:$0xf0]  ;;  %v1700_v22 = vor.u32 %v1936_v19, %v1699_v18  ;;  %v1691_v24 = vld [vmem:[#allocation2 + $0x30] sm:$0xf] }
  0x32   : > { %v1704_v23 = vor.u32 %v1935_v20, %v1701_v21  ;;  %v1934_v25 = vld [vmem:[#allocation2 + $0x34] sm:$0xf0]  ;;  %v1933_v26 = vld [vmem:[#allocation2 + $0x34] sm:$0xf]  ;;  %v1693_v27 = vld [vmem:[#allocation2 + $0x38] sm:$0xf0] }
  0x33   : > { %532 = vmatpush.bf16.msra.mxu0 %v1716_v10  ;;  %p416_p13 = scmp.lt.s32.totalorder %s2370_s17, 1  ;;  %v1692_v28 = vor.u32 %v1934_v25, %v1691_v24  ;;  %v1696_v29 = vor.u32 %v1933_v26, %v1693_v27  ;;  %v1683_v30 = vld [vmem:[#allocation2 + $0x20] sm:$0xf]  ;;  %v1932_v31 = vld [vmem:[#allocation2 + $0x24] sm:$0xf0]  ;;  %vm692_vm5 = vcmask 1040384  }
  0x34   : > { %561 = vmatpush.bf16.msra.mxu1 %v1720_v11  ;;  %v1931_v32 = vld [vmem:[#allocation2 + $0x24] sm:$0xf]  ;;  %v1685_v33 = vld [vmem:[#allocation2 + $0x28] sm:$0xf0]  ;;  %v1684_v34 = vor.u32 %v1932_v31, %v1683_v30  ;;  %v1675_v36 = vld [vmem:[#allocation2 + $0x10] sm:$0xf] }
  0x35   : > { %s417_s1 = scalar_select %p416_p13, %s2370_s17, 1  ;;  %v1688_v35 = vor.u32 %v1931_v32, %v1685_v33  ;;  %v1930_v37 = vld [vmem:[#allocation2 + $0x14] sm:$0xf0]  ;;  %v1929_v38 = vld [vmem:[#allocation2 + $0x14] sm:$0xf] }
  0x36   : > { %v1677_v39 = vld [vmem:[#allocation2 + $0x18] sm:$0xf0]  ;;  %v1676_v40 = vor.u32 %v1930_v37, %v1675_v36  ;;  %v1667_v42 = vld [vmem:[#allocation2] sm:$0xf]  ;;  %v1928_v43 = vld [vmem:[#allocation2 + $0x4] sm:$0xf0] }
  0x37   : > { %533 = vmatpush.bf16.msra.mxu0 %v1708_v16  ;;  %s1926_s5 = sshll.u32 %s417_s1, 6  ;;  %v1680_v41 = vor.u32 %v1929_v38, %v1677_v39  ;;  %v1927_v44 = vld [vmem:[#allocation2 + $0x4] sm:$0xf]  ;;  %v1669_v45 = vld [vmem:[#allocation2 + $0x8] sm:$0xf0]  ;;  %v1668_v46 = vor.u32 %v1928_v43, %v1667_v42  ;;  %s413_s11 = sand.u32 1, %s2274_s14  }
  0x38   : > { %562 = vmatpush.bf16.msra.mxu1 %v1712_v17  ;;  %s420_s19 = scalar_lea.vmem %s2969_s0, %s1926_s5  ;;  %v1672_v49 = vor.u32 %v1927_v44, %v1669_v45  ;;  %s1662_s28 = sshll.u32 %s413_s11, 6 }
  0x39   : > { %v421_v47 = vld [vmem:[%s420_s19] sm:$0xff]  ;;  %v422_v48 = vld [vmem:[%s420_s19 + $0x8] sm:$0xff]  ;;  %v423_v51 = vld [vmem:[%s420_s19 + $0x10] sm:$0xff]  ;;  %s1991_s30 = sshll.u32 %s2370_s17, 6  ;;  %s415_s17 = scalar_lea.vmem [#allocation10], %s1662_s28 }
  0x3a   : > { %v447_v50 = vpack.c.bf16 %v422_v48, %v421_v47  ;;  %v424_v52 = vld [vmem:[%s420_s19 + $0x18] sm:$0xff]  ;;  %v425_v54 = vld [vmem:[%s420_s19 + $0x20] sm:$0xff]  ;;  %v426_v55 = vld [vmem:[%s420_s19 + $0x28] sm:$0xff]  ;;  %s1543_s13 = scalar_lea.hbm %s2979_s10, %s1991_s30  ;;  %s1544_s15 = sshll.u32 %s415_s17, 4  ;;  %s1545_s15 = int_to_ptr.vmem [resolvable:$true] %s1544_s15 }
  0x3b   : > { %534 = vmatpush.bf16.msra.mxu0 %v1700_v22  ;;  %v448_v53 = vpack.c.bf16 %v424_v52, %v423_v51  ;;  %v449_v56 = vpack.c.bf16 %v426_v55, %v425_v54  ;;  %v427_v57 = vld [vmem:[%s420_s19 + $0x30] sm:$0xff]  ;;  %v428_v58 = vld [vmem:[%s420_s19 + $0x38] sm:$0xff]  ;;  %s1546_s19 = sshll.u32 %s1543_s13, 4  ;;  %s1532_s22 = scalar_lea.sflag [#allocation4], %s413_s11  ;;  %s1547_s19 = int_to_ptr.hbm [resolvable:$true] %s1546_s19 }
  0x3c   : > { %563 = vmatpush.bf16.msra.mxu1 %v1704_v23  ;;  %v450_v59 = vpack.c.bf16 %v428_v58, %v427_v57  ;;  %v1957_v48 = vld [vmem:[%s2973_s4 + $0x74] sm:$0xf]  ;;  %v1787_v57 = vld [vmem:[%s2973_s4 + $0x70] sm:$0xf]  ;;  %v1958_v58 = vld [vmem:[%s2973_s4 + $0x74] sm:$0xf0] }
  0x3d   : > { %s2222_s24 = sshra.s32 %s1547_s19, 4  ;;  %s2228_s26 = scalar_lea.hbm %s2979_s10, 128  ;;  %s2223_s24 = int_to_ptr.hbm [resolvable:$true] %s2222_s24 }
  0x3e   : > { %s2224_s25 = scalar_lea.hbm %s2223_s24, 64  ;;  %p2229_p3 = scmp.lt.s32.totalorder %s2223_s24, %s2979_s10 }
  0x3f   : > { %535 = vmatpush.bf16.msra.mxu0 %v1692_v28  ;;  %p2225_p0 = scmp.ne.s32.totalorder %s2223_s24, %s2224_s25  ;;  %p2230_p4 = scmp.lt.s32.totalorder %s2228_s26, %s2224_s25 }
  0x40   : > { %564 = vmatpush.bf16.msra.mxu1 %v1696_v29 }
  0x41   : > { %p2226_p1 = pnand %p2225_p0, %p2387_p5  ;;  %p2231_p7 = por %p2230_p4, %p2229_p3 }
  0x43   : > { %536 = vmatpush.bf16.msra.mxu0 %v1684_v34  ;;  %p2227_p2 = pneg %p2226_p1 }
  0x44   : > { %565 = vmatpush.bf16.msra.mxu1 %v1688_v35 }
  0x45   : > { %p2232_p8 = pnand %p2231_p7, %p2227_p2 }
  0x47   : > { %537 = vmatpush.bf16.msra.mxu0 %v1676_v40 }
  0x48   : > { %566 = vmatpush.bf16.msra.mxu1 %v1680_v41 }
  0x4b   : > { %538 = vmatpush.bf16.msra.mxu0 %v1668_v46 }
  0x4c   : > { %567 = vmatpush.bf16.msra.mxu1 %v1672_v49  ;;  %v1789_v49 = vld [vmem:[%s2973_s4 + $0x78] sm:$0xf0] }
  0x4d   : > { %v1792_v55 = vor.u32 %v1957_v48, %v1789_v49 }
  0x4e   : > { %539 = vmatmul.bf16.vlgmr.msra.gmra.mxu0 %v447_v50 }
  0x4f   : > { %568 = vmatmul.bf16.vlgmr.msra.gmra.mxu1 %v447_v50  ;;  %v1973_v50 = vld [vmem:[%s2973_s4 + $0xf4] sm:$0xf]  ;;  %1022 = vmatpush.bf16.msrb.mxu0 %v1792_v55  ;;  %v1954_v55 = vld [vmem:[%s2973_s4 + $0x54] sm:$0xf0] }
  0x5e   : > { %544 = vmatmul.bf16.gmra.mxu0 %v448_v53 }
  0x5f   : > { %573 = vmatmul.bf16.gmra.mxu1 %v448_v53 }
  0x6e   : > { %549 = vmatmul.bf16.gmra.mxu0 %v449_v56 }
  0x6f   : > { %578 = vmatmul.bf16.gmra.mxu1 %v449_v56  ;;  %v1853_v56 = vld [vmem:[%s2973_s4 + $0xf8] sm:$0xf0] }
  0x7e   : > { %554 = vmatmul.bf16.gmra.mxu0 %v450_v59 }
  0x7f   : > { %583 = vmatmul.bf16.gmra.mxu1 %v450_v59 }
  0xcb   : > { %v2449_v60 = vpop.f32.mrf.mxu0 }
  0xcc   : > { %v2451_v61 = vpop.f32.mrf.mxu1  ;;  %v617_v10 = vmul.f32 %v2449_v60, %v2449_v60 }
  0xcd   : > { %v618_v12 = vmul.f32 %v2451_v61, %v2451_v61 }
  0xd3   : > { %v2453_v62 = vpop.f32.mrf.mxu0 }
  0xd4   : > { %v2455_v63 = vpop.f32.mrf.mxu1  ;;  %v619_v8 = vmul.f32 %v2453_v62, %v2453_v62  ;;  %v589_v13 = vadd.f32 %v2453_v62, %v2449_v60 }
  0xd5   : > { %v620_v9 = vmul.f32 %v2455_v63, %v2455_v63  ;;  %v602_v16 = vadd.f32 %v2455_v63, %v2451_v61 }
  0xd6   : > { %v633_v15 = vadd.f32 %v619_v8, %v617_v10  ;;  %v1788_v10 = vor.u32 %v1958_v58, %v1787_v57  ;;  %v1951_v58 = vld [vmem:[%s2973_s4 + $0x44] sm:$0xf] }
  0xd7   : > { %v646_v18 = vadd.f32 %v620_v9, %v618_v12  ;;  %v1856_v9 = vor.u32 %v1973_v50, %v1853_v56  ;;  %v1974_v12 = vld [vmem:[%s2973_s4 + $0xf4] sm:$0xf0] }
  0xd8   : > { %964 = vmatpush.bf16.msra.mxu2 %v1788_v10 }
  0xd9   : > { %1051 = vmatpush.bf16.msrb.mxu1 %v1856_v9 }
  0xdb   : > { %v2457_v0 = vpop.f32.mrf.mxu0 }
  0xdc   : > { %v2459_v1 = vpop.f32.mrf.mxu1  ;;  %v621_v11 = vmul.f32 %v2457_v0, %v2457_v0  ;;  %v590_v19 = vadd.f32 %v589_v13, %v2457_v0 }
  0xdd   : > { %v622_v14 = vmul.f32 %v2459_v1, %v2459_v1  ;;  %v603_v22 = vadd.f32 %v602_v16, %v2459_v1 }
  0xde   : > { %v634_v21 = vadd.f32 %v633_v15, %v621_v11  ;;  %v1851_v11 = vld [vmem:[%s2973_s4 + $0xf0] sm:$0xf] }
  0xdf   : > { %v647_v25 = vadd.f32 %v646_v18, %v622_v14  ;;  %v1852_v15 = vor.u32 %v1974_v12, %v1851_v11  ;;  %v1955_v18 = vld [vmem:[%s2973_s4 + $0x64] sm:$0xf] }
  0xe0   : > { %v1967_v12 = vld [vmem:[%s2973_s4 + $0xc4] sm:$0xf] }
  0xe1   : > { %993 = vmatpush.bf16.msra.mxu3 %v1852_v15 }
  0xe3   : > { %v2461_v2 = vpop.f32.mrf.mxu0 }
  0xe4   : > { %v2463_v3 = vpop.f32.mrf.mxu1  ;;  %v623_v17 = vmul.f32 %v2461_v2, %v2461_v2  ;;  %v591_v26 = vadd.f32 %v590_v19, %v2461_v2  ;;  %v1781_v19 = vld [vmem:[%s2973_s4 + $0x68] sm:$0xf0] }
  0xe5   : > { %v624_v20 = vmul.f32 %v2463_v3, %v2463_v3  ;;  %v604_v30 = vadd.f32 %v603_v22, %v2463_v3  ;;  %v1784_v22 = vor.u32 %v1955_v18, %v1781_v19  ;;  %v1970_v18 = vld [vmem:[%s2973_s4 + $0xd4] sm:$0xf0] }
  0xe6   : > { %v635_v29 = vadd.f32 %v634_v21, %v623_v17 }
  0xe7   : > { %v648_v32 = vadd.f32 %v647_v25, %v624_v20  ;;  %v1845_v25 = vld [vmem:[%s2973_s4 + $0xe8] sm:$0xf0]  ;;  %1023 = vmatpush.bf16.msrb.mxu0 %v1784_v22  ;;  %v1763_v22 = vld [vmem:[%s2973_s4 + $0x40] sm:$0xf] }
  0xeb   : > { %v2465_v4 = vpop.f32.mrf.mxu0 }
  0xec   : > { %v2467_v5 = vpop.f32.mrf.mxu1  ;;  %v625_v23 = vmul.f32 %v2465_v4, %v2465_v4  ;;  %v592_v33 = vadd.f32 %v591_v26, %v2465_v4 }
  0xed   : > { %v626_v27 = vmul.f32 %v2467_v5, %v2467_v5  ;;  %v605_v36 = vadd.f32 %v604_v30, %v2467_v5  ;;  %v1779_v30 = vld [vmem:[%s2973_s4 + $0x60] sm:$0xf] }
  0xee   : > { %v636_v35 = vadd.f32 %v635_v29, %v625_v23  ;;  %v1971_v23 = vld [vmem:[%s2973_s4 + $0xe4] sm:$0xf] }
  0xef   : > { %v649_v38 = vadd.f32 %v648_v32, %v626_v27  ;;  %v1848_v29 = vor.u32 %v1971_v23, %v1845_v25  ;;  %v1952_v23 = vld [vmem:[%s2973_s4 + $0x44] sm:$0xf0] }
  0xf1   : > { %1052 = vmatpush.bf16.msrb.mxu1 %v1848_v29  ;;  %v1757_v29 = vld [vmem:[%s2973_s4 + $0x38] sm:$0xf0] }
  0xf3   : > { %v2469_v6 = vpop.f32.mrf.mxu0 }
  0xf4   : > { %v2471_v7 = vpop.f32.mrf.mxu1  ;;  %v627_v31 = vmul.f32 %v2469_v6, %v2469_v6  ;;  %v593_v39 = vadd.f32 %v592_v33, %v2469_v6 }
  0xf5   : > { %v628_v34 = vmul.f32 %v2471_v7, %v2471_v7  ;;  %v606_v42 = vadd.f32 %v605_v36, %v2471_v7  ;;  %v1972_v36 = vld [vmem:[%s2973_s4 + $0xe4] sm:$0xf0] }
  0xf6   : > { %v637_v41 = vadd.f32 %v636_v35, %v627_v31  ;;  %v1956_v31 = vld [vmem:[%s2973_s4 + $0x64] sm:$0xf0]  ;;  %v1843_v35 = vld [vmem:[%s2973_s4 + $0xe0] sm:$0xf] }
  0xf7   : > { %v650_v43 = vadd.f32 %v649_v38, %v628_v34  ;;  %v1780_v34 = vor.u32 %v1956_v31, %v1779_v30  ;;  %v1764_v30 = vor.u32 %v1952_v23, %v1763_v22  ;;  %v1739_v22 = vld [vmem:[%s2973_s4 + $0x10] sm:$0xf] }
  0xf9   : > { %965 = vmatpush.bf16.msra.mxu2 %v1780_v34  ;;  %v1965_v34 = vld [vmem:[%s2973_s4 + $0xb4] sm:$0xf] }
  0xfb   : > { %v2497_v24 = vpop.f32.mrf.mxu0 }
  0xfc   : > { %v2502_v28 = vpop.f32.mrf.mxu1  ;;  %v629_v37 = vmul.f32 %v2497_v24, %v2497_v24  ;;  %v594_v44 = vadd.f32 %v593_v39, %v2497_v24  ;;  %v1953_v39 = vld [vmem:[%s2973_s4 + $0x54] sm:$0xf] }
  0xfd   : > { %v630_v40 = vmul.f32 %v2502_v28, %v2502_v28  ;;  %v607_v46 = vadd.f32 %v606_v42, %v2502_v28 }
  0xfe   : > { %v638_v45 = vadd.f32 %v637_v41, %v629_v37  ;;  %v1844_v41 = vor.u32 %v1972_v36, %v1843_v35  ;;  %v1821_v35 = vld [vmem:[%s2973_s4 + $0xb8] sm:$0xf0] }
  0xff   : > { %v651_v51 = vadd.f32 %v650_v43, %v630_v40  ;;  %v1773_v40 = vld [vmem:[%s2973_s4 + $0x58] sm:$0xf0] }
 0x100   : > { %994 = vmatpush.bf16.msra.mxu3 %v1844_v41 }
 0x103   : > { %v2519_v47 = vpop.f32.mrf.mxu0 }
 0x104   : > { %v595_v52 = vadd.f32 %v594_v44, %v2519_v47  ;;  %v631_v53 = vmul.f32 %v2519_v47, %v2519_v47  ;;  %v2533_v54 = vpop.f32.mrf.mxu1  ;;  %v1776_v44 = vor.u32 %v1953_v39, %v1773_v40  ;;  %v1827_v39 = vld [vmem:[%s2973_s4 + $0xc0] sm:$0xf]  ;;  %v1968_v40 = vld [vmem:[%s2973_s4 + $0xc4] sm:$0xf0] }
 0x105   : > { %v608_v59 = vadd.f32 %v607_v46, %v2533_v54  ;;  %v632_v8 = vmul.f32 %v2533_v54, %v2533_v54  ;;  %v1837_v46 = vld [vmem:[%s2973_s4 + $0xd8] sm:$0xf0] }
 0x106   : > { %v596_v13 = vrot.slane %v595_v52, 4  ;;  %v639_v14 = vadd.f32 %v638_v45, %v631_v53  ;;  %v1969_v45 = vld [vmem:[%s2973_s4 + $0xd4] sm:$0xf]  ;;  %1024 = vmatpush.bf16.msrb.mxu0 %v1776_v44  ;;  %v1771_v53 = vld [vmem:[%s2973_s4 + $0x50] sm:$0xf] }
 0x107   : > { %v609_v16 = vrot.slane %v608_v59, 4  ;;  %v652_v17 = vadd.f32 %v651_v51, %v632_v8  ;;  %v1840_v50 = vor.u32 %v1969_v45, %v1837_v46  ;;  %v1772_v8 = vor.u32 %v1954_v55, %v1771_v53  ;;  %v1950_v44 = vld [vmem:[%s2973_s4 + $0x34] sm:$0xf0]  ;;  %v1819_v45 = vld [vmem:[%s2973_s4 + $0xb0] sm:$0xf] }
 0x108   : > { %v597_v20 = vadd.f32 %v596_v13, %v595_v52  ;;  %v640_v21 = vrot.slane %v639_v14, 4  ;;  %v1829_v13 = vld [vmem:[%s2973_s4 + $0xc8] sm:$0xf0] }
 0x109   : > { %v610_v26 = vadd.f32 %v609_v16, %v608_v59  ;;  %v653_v27 = vrot.slane %v652_v17, 4  ;;  %1053 = vmatpush.bf16.msrb.mxu1 %v1840_v50  ;;  %v1765_v59 = vld [vmem:[%s2973_s4 + $0x48] sm:$0xf0]  ;;  %v1832_v16 = vor.u32 %v1967_v12, %v1829_v13  ;;  %966 = vmatpush.bf16.msra.mxu2 %v1772_v8  ;;  %v1963_v50 = vld [vmem:[%s2973_s4 + $0xa4] sm:$0xf] }
 0x10a   : > { %v598_v32 = vrot.slane %v597_v20, 2  ;;  %v641_v33 = vadd.f32 %v640_v21, %v639_v14  ;;  %v1768_v11 = vor.u32 %v1951_v58, %v1765_v59  ;;  %v1813_v55 = vld [vmem:[%s2973_s4 + $0xa8] sm:$0xf0]  ;;  %v1747_v8 = vld [vmem:[%s2973_s4 + $0x20] sm:$0xf] }
 0x10b   : > { %v611_v37 = vrot.slane %v610_v26, 2  ;;  %v654_v38 = vadd.f32 %v653_v27, %v652_v17  ;;  %v1835_v17 = vld [vmem:[%s2973_s4 + $0xd0] sm:$0xf]  ;;  %v1949_v27 = vld [vmem:[%s2973_s4 + $0x34] sm:$0xf]  ;;  %v1816_v58 = vor.u32 %v1963_v50, %v1813_v55 }
 0x10c   : > { %v599_v42 = vadd.f32 %v598_v32, %v597_v20  ;;  %v642_v43 = vrot.slane %v641_v33, 2  ;;  %1025 = vmatpush.bf16.msrb.mxu0 %v1768_v11  ;;  %v1836_v21 = vor.u32 %v1970_v18, %v1835_v17  ;;  %v1811_v12 = vld [vmem:[%s2973_s4 + $0xa0] sm:$0xf]  ;;  %v1964_v13 = vld [vmem:[%s2973_s4 + $0xa4] sm:$0xf0] }
 0x10d   : > { %v612_v48 = vadd.f32 %v611_v37, %v610_v26  ;;  %v655_v49 = vrot.slane %v654_v38, 2  ;;  %1054 = vmatpush.bf16.msrb.mxu1 %v1832_v16  ;;  %967 = vmatpush.bf16.msra.mxu2 %v1764_v30  ;;  %v1741_v16 = vld [vmem:[%s2973_s4 + $0x18] sm:$0xf0]  ;;  %v1961_v18 = vld [vmem:[%s2973_s4 + $0x94] sm:$0xf] }
 0x10e   : > { %v600_v51 = vrot.slane %v599_v42, 1  ;;  %v643_v52 = vadd.f32 %v642_v43, %v641_v33  ;;  %v1760_v33 = vor.u32 %v1949_v27, %v1757_v29  ;;  %995 = vmatpush.bf16.msra.mxu3 %v1836_v21  ;;  %v1755_v43 = vld [vmem:[%s2973_s4 + $0x30] sm:$0xf]  ;;  %v1812_v21 = vor.u32 %v1964_v13, %v1811_v12  ;;  %v1962_v29 = vld [vmem:[%s2973_s4 + $0x94] sm:$0xf0] }
 0x10f   : > { %v613_v56 = vrot.slane %v612_v48, 1  ;;  %v656_v57 = vadd.f32 %v655_v49, %v654_v38  ;;  %v1824_v38 = vor.u32 %v1965_v34, %v1821_v35  ;;  %v1749_v49 = vld [vmem:[%s2973_s4 + $0x28] sm:$0xf0]  ;;  %v1803_v27 = vld [vmem:[%s2973_s4 + $0x90] sm:$0xf] }
 0x110   : > { %v601_v9 = vadd.f32 %v600_v51, %v599_v42  ;;  %v644_v10 = vrot.slane %v643_v52, 1  ;;  %1026 = vmatpush.bf16.msrb.mxu0 %v1760_v33  ;;  %v1828_v42 = vor.u32 %v1968_v40, %v1827_v39  ;;  %v1756_v51 = vor.u32 %v1950_v44, %v1755_v43  ;;  %v1959_v33 = vld [vmem:[%s2973_s4 + $0x84] sm:$0xf]  ;;  %v1797_v35 = vld [vmem:[%s2973_s4 + $0x88] sm:$0xf0] }
 0x111   : > { %v614_v14 = vadd.f32 %v613_v56, %v612_v48  ;;  %v657_v15 = vrot.slane %v656_v57, 1  ;;  %1055 = vmatpush.bf16.msrb.mxu1 %v1824_v38  ;;  %v1947_v48 = vld [vmem:[%s2973_s4 + $0x24] sm:$0xf]  ;;  %v1966_v56 = vld [vmem:[%s2973_s4 + $0xb4] sm:$0xf0]  ;;  %v1804_v38 = vor.u32 %v1962_v29, %v1803_v27  ;;  %v1800_v39 = vor.u32 %v1959_v33, %v1797_v35 }
 0x112   : > { %v2613_v19 = vmul.f32 0.015625, %v601_v9  ;;  %v645_v20 = vadd.f32 %v644_v10, %v643_v52  ;;  %v1752_v53 = vor.u32 %v1947_v48, %v1749_v49  ;;  %996 = vmatpush.bf16.msra.mxu3 %v1828_v42  ;;  %968 = vmatpush.bf16.msra.mxu2 %v1756_v51  ;;  %v1820_v59 = vor.u32 %v1966_v56, %v1819_v45  ;;  %v1948_v9 = vld [vmem:[%s2973_s4 + $0x24] sm:$0xf0] }
 0x113   : > { %v2621_v25 = vmul.f32 0.015625, %v614_v14  ;;  %v658_v26 = vadd.f32 %v657_v15, %v656_v57  ;;  %v1748_v11 = vor.u32 %v1948_v9, %v1747_v8  ;;  %v1945_v15 = vld [vmem:[%s2973_s4 + $0x14] sm:$0xf]  ;;  %v1960_v42 = vld [vmem:[%s2973_s4 + $0x84] sm:$0xf0] }
 0x114   : > { %v659_v31 = vmul.f32 0.015625, %v645_v20  ;;  %v661_v32 = vmul.f32 %v2613_v19, %v2613_v19  ;;  %1027 = vmatpush.bf16.msrb.mxu0 %v1752_v53  ;;  %v1744_v17 = vor.u32 %v1945_v15, %v1741_v16  ;;  %v1805_v20 = vld [vmem:[%s2973_s4 + $0x98] sm:$0xf0] }
 0x115   : > { %v660_v36 = vmul.f32 0.015625, %v658_v26  ;;  %v662_v37 = vmul.f32 %v2621_v25, %v2621_v25  ;;  %1056 = vmatpush.bf16.msrb.mxu1 %v1816_v58  ;;  %v1808_v23 = vor.u32 %v1961_v18, %v1805_v20  ;;  %v1946_v26 = vld [vmem:[%s2973_s4 + $0x14] sm:$0xf0] }
 0x116   : > { %v663_v41 = vsub.f32 %v659_v31, %v661_v32  ;;  %997 = vmatpush.bf16.msra.mxu3 %v1820_v59  ;;  %969 = vmatpush.bf16.msra.mxu2 %v1748_v11  ;;  %v1740_v30 = vor.u32 %v1946_v26, %v1739_v22  ;;  %v1943_v31 = vld [vmem:[%s2973_s4 + $0x4] sm:$0xf]  ;;  %v1733_v32 = vld [vmem:[%s2973_s4 + $0x8] sm:$0xf0]  ;;  %v445_v59 = vld [vmem:[%s2971_s2] sm:$0x3] }
 0x117   : > { %v664_v46 = vsub.f32 %v660_v36, %v662_v37  ;;  %v1736_v34 = vor.u32 %v1943_v31, %v1733_v32  ;;  %v1731_v36 = vld [vmem:[%s2973_s4] sm:$0xf]  ;;  %v1944_v37 = vld [vmem:[%s2973_s4 + $0x4] sm:$0xf0] }
 0x118   : > { %v665_v52 = vmax.f32 %v663_v41, 0.0  ;;  %1028 = vmatpush.bf16.msrb.mxu0 %v1744_v17  ;;  %v1732_v40 = vor.u32 %v1944_v37, %v1731_v36  ;;  %v1795_v41 = vld [vmem:[%s2973_s4 + $0x80] sm:$0xf] }
 0x119   : > { %v666_v57 = vmax.f32 %v664_v46, 0.0  ;;  %1057 = vmatpush.bf16.msrb.mxu1 %v1808_v23  ;;  %v1796_v48 = vor.u32 %v1960_v42, %v1795_v41 }
 0x11a   : > { %v2675_v10 = vadd.f32 1e-05, %v665_v52  ;;  %998 = vmatpush.bf16.msra.mxu3 %v1812_v21  ;;  %970 = vmatpush.bf16.msra.mxu2 %v1740_v30 }
 0x11b   : > { %v668_v14 = vadd.f32 1e-05, %v666_v57 }
 0x11c   : > { %2078 = vrsqrt.f32 %v2675_v10  ;;  %1029 = vmatpush.bf16.msrb.mxu0 %v1736_v34  ;;  %vm675_vm4 = vweird.f32 %v2675_v10 }
 0x11d   : > { %2080 = vrsqrt.f32 %v668_v14  ;;  %1058 = vmatpush.bf16.msrb.mxu1 %v1800_v39  ;;  %vm685_vm2 = vweird.f32 %v668_v14 }
 0x11e   : > { %999 = vmatpush.bf16.msra.mxu3 %v1804_v38  ;;  %971 = vmatpush.bf16.msra.mxu2 %v1732_v40 }
 0x122   : > { %v2079_v43 = vpop.eup %2078  ;;  %1000 = vmatpush.bf16.msra.mxu3 %v1796_v48 }
 0x123   : > { %v2081_v44 = vpop.eup %2080  ;;  %v670_v45 = vmul.f32 %v2079_v43, %v2675_v10  ;;  %vm676_vm1 = vweird.f32 %v2079_v43  ;;  %v446_v10 = vld [vmem:[%s2972_s3] sm:$0x3] }
 0x124   : > { %v680_v46 = vmul.f32 %v2081_v44, %v668_v14  ;;  %vm686_vm0 = vweird.f32 %v2081_v44  ;;  %vm677_vm6 = vmor %vm675_vm4, %vm676_vm1 }
 0x125   : > { %v671_v49 = vmul.f32 %v2079_v43, %v670_v45  ;;  %vm687_vm3 = vmor %vm685_vm2, %vm686_vm0 }
 0x126   : > { %v681_v50 = vmul.f32 %v2081_v44, %v680_v46 }
 0x127   : > { %v672_v51 = vmul.f32 0.5, %v671_v49 }
 0x128   : > { %v682_v52 = vmul.f32 0.5, %v681_v50 }
 0x129   : > { %v673_v53 = vsub.f32 1.5, %v672_v51 }
 0x12a   : > { %v683_v55 = vsub.f32 1.5, %v682_v52 }
 0x12b   : > { %v674_v56 = vmul.f32 %v2079_v43, %v673_v53 }
 0x12c   : > { %v684_v57 = vmul.f32 %v2081_v44, %v683_v55 }
 0x12d   : > { %v678_v9 = vsel %vm677_vm6, %v2079_v43, %v674_v56 }
 0x12e   : > { %v688_v58 = vsel %vm687_vm3, %v2081_v44, %v684_v57 }
 0x12f   : > { %v691_v8 = vrot.slane %v688_v58, 7 }
 0x131   : > { %v693_v11 = vsel %vm692_vm5, %v678_v9, %v691_v8 }
 0x132   : > { %v695_v12 = vmul.f32 %v693_v11, %v445_v59 }
 0x134   : > { %v2738_v13 = vperm.slane %v695_v12, 0  ;;  %v2740_v15 = vperm.slane %v695_v12, 1 }
 0x136   : > { %v702_v14 = vmul.f32 %v2740_v15, %v2621_v25  ;;  %v701_v16 = vmul.f32 %v2738_v13, %v2613_v19  ;;  %v709_v21 = vmul.f32 %v2738_v13, %v2449_v60  ;;  %v711_v22 = vmul.f32 %v2738_v13, %v2453_v62 }
 0x137   : > { %v710_v25 = vmul.f32 %v2740_v15, %v2451_v61  ;;  %v712_v27 = vmul.f32 %v2740_v15, %v2455_v63  ;;  %v713_v61 = vmul.f32 %v2738_v13, %v2457_v0  ;;  %v715_v62 = vmul.f32 %v2738_v13, %v2461_v2 }
 0x138   : > { %v705_v17 = vrot.slane %v702_v14, 7  ;;  %v714_v63 = vmul.f32 %v2740_v15, %v2459_v1  ;;  %v716_v37 = vmul.f32 %v2740_v15, %v2463_v3  ;;  %v717_v0 = vmul.f32 %v2738_v13, %v2465_v4 }
 0x139   : > { %v719_v1 = vmul.f32 %v2738_v13, %v2469_v6  ;;  %v718_v2 = vmul.f32 %v2740_v15, %v2467_v5  ;;  %v720_v3 = vmul.f32 %v2740_v15, %v2471_v7  ;;  %v724_v4 = vmul.f32 %v2740_v15, %v2533_v54 }
 0x13a   : > { %v706_v18 = vsel %vm692_vm5, %v701_v16, %v705_v17  ;;  %v721_v5 = vmul.f32 %v2738_v13, %v2497_v24  ;;  %v723_v6 = vmul.f32 %v2738_v13, %v2519_v47  ;;  %v722_v7 = vmul.f32 %v2740_v15, %v2502_v28 }
 0x13b   : > { %v708_v20 = vsub.f32 %v446_v10, %v706_v18 }
 0x13d   : > { %v726_v23 = vperm.slane %v708_v20, 0  ;;  %v727_v26 = vperm.slane %v708_v20, 1 }
 0x13f   : > { %v730_v29 = vadd.f32 %v726_v23, %v709_v21  ;;  %v732_v19 = vadd.f32 %v726_v23, %v711_v22  ;;  %v731_v30 = vadd.f32 %v727_v26, %v710_v25  ;;  %v733_v31 = vadd.f32 %v727_v26, %v712_v27 }
 0x140   : > { %v734_v38 = vadd.f32 %v726_v23, %v713_v61  ;;  %v736_v39 = vadd.f32 %v726_v23, %v715_v62  ;;  %v735_v40 = vadd.f32 %v727_v26, %v714_v63  ;;  %v737_v41 = vadd.f32 %v727_v26, %v716_v37 }
 0x141   : > { %v746_v32 = vmax.f32 %v730_v29, 0.0  ;;  %v748_v33 = vmax.f32 %v732_v19, 0.0  ;;  %v747_v34 = vmax.f32 %v731_v30, 0.0  ;;  %v749_v35 = vmax.f32 %v733_v31, 0.0 }
 0x142   : > { %v750_v42 = vmax.f32 %v734_v38, 0.0  ;;  %v752_v43 = vmax.f32 %v736_v39, 0.0  ;;  %v751_v44 = vmax.f32 %v735_v40, 0.0  ;;  %v753_v45 = vmax.f32 %v737_v41, 0.0 }
 0x143   : > { %v796_v60 = vpack.c.bf16 %v748_v33, %v746_v32  ;;  %v797_v36 = vpack.c.bf16 %v749_v35, %v747_v34  ;;  %v738_v49 = vadd.f32 %v726_v23, %v717_v0  ;;  %v740_v50 = vadd.f32 %v726_v23, %v719_v1 }
 0x144   : > { %v798_v46 = vpack.c.bf16 %v752_v43, %v750_v42  ;;  %v799_v48 = vpack.c.bf16 %v753_v45, %v751_v44  ;;  %v739_v51 = vadd.f32 %v727_v26, %v718_v2  ;;  %v741_v52 = vadd.f32 %v727_v26, %v720_v3 }
 0x145   : > { %972 = vmatmul.bf16.vlgmr.msra.gmra.mxu2 %v796_v60  ;;  %1001 = vmatmul.bf16.vlgmr.msra.gmra.mxu3 %v797_v36  ;;  %v754_v53 = vmax.f32 %v738_v49, 0.0  ;;  %v756_v55 = vmax.f32 %v740_v50, 0.0  ;;  %v742_v8 = vadd.f32 %v726_v23, %v721_v5  ;;  %v744_v9 = vadd.f32 %v726_v23, %v723_v6 }
 0x146   : > { %1030 = vmatmul.bf16.vlgmr.msrb.gmra.mxu0 %v796_v60  ;;  %1059 = vmatmul.bf16.vlgmr.msrb.gmra.mxu1 %v797_v36  ;;  %v755_v56 = vmax.f32 %v739_v51, 0.0  ;;  %v757_v57 = vmax.f32 %v741_v52, 0.0  ;;  %v743_v11 = vadd.f32 %v727_v26, %v722_v7  ;;  %v745_v12 = vadd.f32 %v727_v26, %v724_v4 }
 0x147   : > { %v800_v58 = vpack.c.bf16 %v756_v55, %v754_v53  ;;  %v758_v14 = vmax.f32 %v742_v8, 0.0  ;;  %v760_v10 = vmax.f32 %v744_v9, 0.0 }
 0x148   : > { %v801_v59 = vpack.c.bf16 %v757_v57, %v755_v56  ;;  %v759_v16 = vmax.f32 %v743_v11, 0.0  ;;  %v761_v17 = vmax.f32 %v745_v12, 0.0 }
 0x149   : > { %v802_v18 = vpack.c.bf16 %v760_v10, %v758_v14 }
 0x14a   : > { %v803_v20 = vpack.c.bf16 %v761_v17, %v759_v16 }
 0x155   : > { %977 = vmatmul.bf16.gmra.mxu2 %v798_v46  ;;  %1006 = vmatmul.bf16.gmra.mxu3 %v799_v48 }
 0x156   : > { %1035 = vmatmul.bf16.gmra.mxu0 %v798_v46  ;;  %1064 = vmatmul.bf16.gmra.mxu1 %v799_v48 }
 0x165   : > { %982 = vmatmul.bf16.gmra.mxu2 %v800_v58  ;;  %1011 = vmatmul.bf16.gmra.mxu3 %v801_v59 }
 0x166   : > { %1040 = vmatmul.bf16.gmra.mxu0 %v800_v58  ;;  %1069 = vmatmul.bf16.gmra.mxu1 %v801_v59 }
 0x175   : > { %987 = vmatmul.bf16.gmra.mxu2 %v802_v18  ;;  %1016 = vmatmul.bf16.gmra.mxu3 %v803_v20 }
 0x176   : > { %1045 = vmatmul.bf16.gmra.mxu0 %v802_v18  ;;  %1074 = vmatmul.bf16.gmra.mxu1 %v803_v20 }
 0x1c3   : > { %v1031_v24 = vpop.f32.mrf.mxu0  ;;  %v1060_v54 = vpop.f32.mrf.mxu1 }
 0x1c4   : > { %v2784_v62 = vadd.f32 %v1060_v54, %v1031_v24 }
 0x1c6   : > { %v1109_v42 = vmul.f32 %v2784_v62, %v2784_v62 }
 0x1c8   : > { %v973_v47 = vpop.f32.mrf.mxu2  ;;  %v1002_v13 = vpop.f32.mrf.mxu3 }
 0x1c9   : > { %v2802_v46 = vadd.f32 %v1002_v13, %v973_v47 }
 0x1cb   : > { %v1033_v21 = vpop.f32.mrf.mxu0  ;;  %v1062_v28 = vpop.f32.mrf.mxu1  ;;  %v1108_v58 = vmul.f32 %v2802_v46, %v2802_v46 }
 0x1cc   : > { %v2782_v61 = vadd.f32 %v1062_v28, %v1033_v21 }
 0x1ce   : > { %v1111_v37 = vmul.f32 %v2782_v61, %v2782_v61  ;;  %v1093_v43 = vadd.f32 %v2782_v61, %v2784_v62 }
 0x1d0   : > { %v975_v15 = vpop.f32.mrf.mxu2  ;;  %v1004_v22 = vpop.f32.mrf.mxu3  ;;  %v1137_v2 = vadd.f32 %v1111_v37, %v1109_v42 }
 0x1d1   : > { %v2792_v41 = vadd.f32 %v1004_v22, %v975_v15 }
 0x1d3   : > { %v1036_v23 = vpop.f32.mrf.mxu0  ;;  %v1065_v26 = vpop.f32.mrf.mxu1  ;;  %v1110_v51 = vmul.f32 %v2792_v41, %v2792_v41  ;;  %v1080_v59 = vadd.f32 %v2792_v41, %v2802_v46 }
 0x1d4   : > { %v2786_v63 = vadd.f32 %v1065_v26, %v1036_v23 }
 0x1d5   : > { %v1124_v12 = vadd.f32 %v1110_v51, %v1108_v58 }
 0x1d6   : > { %v1113_v44 = vmul.f32 %v2786_v63, %v2786_v63  ;;  %v1094_v3 = vadd.f32 %v1093_v43, %v2786_v63 }
 0x1d8   : > { %v978_v25 = vpop.f32.mrf.mxu2  ;;  %v1007_v27 = vpop.f32.mrf.mxu3  ;;  %v1138_v53 = vadd.f32 %v1137_v2, %v1113_v44 }
 0x1d9   : > { %v2804_v48 = vadd.f32 %v1007_v27, %v978_v25 }
 0x1db   : > { %v1038_v29 = vpop.f32.mrf.mxu0  ;;  %v1067_v19 = vpop.f32.mrf.mxu1  ;;  %v1112_v4 = vmul.f32 %v2804_v48, %v2804_v48  ;;  %v1081_v14 = vadd.f32 %v1080_v59, %v2804_v48  ;;  %v1982_v59 = vld [vmem:[#allocation7 + $0x38] sm:$0xff] }
 0x1dc   : > { %v2790_v38 = vadd.f32 %v1067_v19, %v1038_v29  ;;  %1390 = vmatpush.bf16.msrb.mxu2 %v1982_v59 }
 0x1dd   : > { %v1125_v24 = vadd.f32 %v1124_v12, %v1112_v4  ;;  %v1990_v4 = vld [vmem:[#allocation7 + $0x78] sm:$0xff] }
 0x1de   : > { %v1115_v49 = vmul.f32 %v2790_v38, %v2790_v38  ;;  %v1095_v55 = vadd.f32 %v1094_v3, %v2790_v38  ;;  %1419 = vmatpush.bf16.msrb.mxu3 %v1990_v4 }
 0x1e0   : > { %v980_v30 = vpop.f32.mrf.mxu2  ;;  %v1009_v31 = vpop.f32.mrf.mxu3  ;;  %v1139_v6 = vadd.f32 %v1138_v53, %v1115_v49 }
 0x1e1   : > { %v2813_v52 = vadd.f32 %v1009_v31, %v980_v30 }
 0x1e3   : > { %v1041_v32 = vpop.f32.mrf.mxu0  ;;  %v1070_v33 = vpop.f32.mrf.mxu1  ;;  %v1114_v10 = vmul.f32 %v2813_v52, %v2813_v52  ;;  %v1082_v54 = vadd.f32 %v1081_v14, %v2813_v52 }
 0x1e4   : > { %v2800_v45 = vadd.f32 %v1070_v33, %v1041_v32 }
 0x1e5   : > { %v1126_v26 = vadd.f32 %v1125_v24, %v1114_v10 }
 0x1e6   : > { %v1117_v56 = vmul.f32 %v2800_v45, %v2800_v45  ;;  %v1096_v7 = vadd.f32 %v1095_v55, %v2800_v45 }
 0x1e8   : > { %v983_v34 = vpop.f32.mrf.mxu2  ;;  %v1012_v35 = vpop.f32.mrf.mxu3  ;;  %v1140_v17 = vadd.f32 %v1139_v6, %v1117_v56 }
 0x1e9   : > { %v2826_v5 = vadd.f32 %v1012_v35, %v983_v34 }
 0x1eb   : > { %v1043_v60 = vpop.f32.mrf.mxu0  ;;  %v1072_v36 = vpop.f32.mrf.mxu1  ;;  %v1116_v47 = vmul.f32 %v2826_v5, %v2826_v5  ;;  %v1083_v25 = vadd.f32 %v1082_v54, %v2826_v5 }
 0x1ec   : > { %v2809_v50 = vadd.f32 %v1072_v36, %v1043_v60 }
 0x1ed   : > { %v1127_v31 = vadd.f32 %v1126_v26, %v1116_v47  ;;  %v1980_v26 = vld [vmem:[#allocation7 + $0x28] sm:$0xff] }
 0x1ee   : > { %v1119_v8 = vmul.f32 %v2809_v50, %v2809_v50  ;;  %v1097_v18 = vadd.f32 %v1096_v7, %v2809_v50 }
 0x1f0   : > { %v985_v39 = vpop.f32.mrf.mxu2  ;;  %v1014_v40 = vpop.f32.mrf.mxu3  ;;  %v1141_v15 = vadd.f32 %v1140_v17, %v1119_v8  ;;  %v1981_v17 = vld [vmem:[#allocation7 + $0x30] sm:$0xff] }
 0x1f1   : > { %v2834_v16 = vadd.f32 %v1014_v40, %v985_v39  ;;  %1391 = vmatpush.bf16.msrb.mxu2 %v1981_v17 }
 0x1f3   : > { %v1046_v0 = vpop.f32.mrf.mxu0  ;;  %v1075_v1 = vpop.f32.mrf.mxu1  ;;  %v1118_v27 = vmul.f32 %v2834_v16, %v2834_v16  ;;  %v1084_v32 = vadd.f32 %v1083_v25, %v2834_v16  ;;  %v1988_v25 = vld [vmem:[#allocation7 + $0x68] sm:$0xff] }
 0x1f4   : > { %v2818_v57 = vadd.f32 %v1075_v1, %v1046_v0 }
 0x1f5   : > { %v1128_v37 = vadd.f32 %v1127_v31, %v1118_v27  ;;  %1392 = vmatpush.bf16.msrb.mxu2 %v1980_v26 }
 0x1f6   : > { %v1121_v20 = vmul.f32 %v2818_v57, %v2818_v57  ;;  %v1098_v22 = vadd.f32 %v1097_v18, %v2818_v57  ;;  %v1989_v18 = vld [vmem:[#allocation7 + $0x70] sm:$0xff] }
 0x1f7   : > { %1420 = vmatpush.bf16.msrb.mxu3 %v1989_v18 }
 0x1f8   : > { %v988_v9 = vpop.f32.mrf.mxu2  ;;  %v1017_v11 = vpop.f32.mrf.mxu3  ;;  %v1142_v29 = vadd.f32 %v1141_v15, %v1121_v20 }
 0x1f9   : > { %v2842_v13 = vadd.f32 %v1017_v11, %v988_v9 }
 0x1fb   : > { %v1048_v21 = vpop.f32.mrf.mxu0  ;;  %v1077_v28 = vpop.f32.mrf.mxu1  ;;  %v1120_v33 = vmul.f32 %v2842_v13, %v2842_v13  ;;  %v1085_v39 = vadd.f32 %v1084_v32, %v2842_v13  ;;  %1421 = vmatpush.bf16.msrb.mxu3 %v1988_v25 }
 0x1fc   : > { %v2845_v23 = vadd.f32 %v1077_v28, %v1048_v21 }
 0x1fd   : > { %v1129_v44 = vadd.f32 %v1128_v37, %v1120_v33  ;;  %v1979_v33 = vld [vmem:[#allocation7 + $0x20] sm:$0xff]  ;;  %v1978_v37 = vld [vmem:[#allocation7 + $0x18] sm:$0xff] }
 0x1fe   : > { %v1099_v19 = vadd.f32 %v1098_v22, %v2845_v23  ;;  %v1123_v30 = vmul.f32 %v2845_v23, %v2845_v23  ;;  %1393 = vmatpush.bf16.msrb.mxu2 %v1979_v33 }
 0x200   : > { %v1100_v34 = vrot.slane %v1099_v19, 4  ;;  %v1143_v35 = vadd.f32 %v1142_v29, %v1123_v30  ;;  %v990_v60 = vpop.f32.mrf.mxu2  ;;  %v1019_v36 = vpop.f32.mrf.mxu3 }
 0x201   : > { %v2857_v40 = vadd.f32 %v1019_v36, %v990_v60 }
 0x202   : > { %v1101_v42 = vadd.f32 %v1100_v34, %v1099_v19  ;;  %v1144_v43 = vrot.slane %v1143_v35, 4  ;;  %v1987_v34 = vld [vmem:[#allocation7 + $0x60] sm:$0xff]  ;;  %1394 = vmatpush.bf16.msrb.mxu2 %v1978_v37 }
 0x203   : > { %v1086_v0 = vadd.f32 %v1085_v39, %v2857_v40  ;;  %v1122_v1 = vmul.f32 %v2857_v40, %v2857_v40  ;;  %1422 = vmatpush.bf16.msrb.mxu3 %v1987_v34  ;;  %v1986_v39 = vld [vmem:[#allocation7 + $0x58] sm:$0xff] }
 0x204   : > { %v1102_v2 = vrot.slane %v1101_v42, 2  ;;  %v1145_v3 = vadd.f32 %v1144_v43, %v1143_v35  ;;  %v1977_v43 = vld [vmem:[#allocation7 + $0x10] sm:$0xff] }
 0x205   : > { %v1087_v49 = vrot.slane %v1086_v0, 4  ;;  %v1130_v51 = vadd.f32 %v1129_v44, %v1122_v1  ;;  %v1985_v44 = vld [vmem:[#allocation7 + $0x50] sm:$0xff] }
 0x206   : > { %v1103_v53 = vadd.f32 %v1102_v2, %v1101_v42  ;;  %v1146_v55 = vrot.slane %v1145_v3, 2  ;;  %1395 = vmatpush.bf16.msrb.mxu2 %v1977_v43  ;;  %v1976_v2 = vld [vmem:[#allocation7 + $0x8] sm:$0xff] }
 0x207   : > { %v1088_v56 = vadd.f32 %v1087_v49, %v1086_v0  ;;  %v1131_v58 = vrot.slane %v1130_v51, 4  ;;  %1423 = vmatpush.bf16.msrb.mxu3 %v1986_v39 }
 0x208   : > { %v1104_v6 = vrot.slane %v1103_v53, 1  ;;  %v1147_v7 = vadd.f32 %v1146_v55, %v1145_v3  ;;  %v1984_v3 = vld [vmem:[#allocation7 + $0x48] sm:$0xff]  ;;  %v1975_v55 = vld [vmem:[#allocation7] sm:$0xff] }
 0x209   : > { %v1089_v8 = vrot.slane %v1088_v56, 2  ;;  %v1132_v9 = vadd.f32 %v1131_v58, %v1130_v51 }
 0x20a   : > { %v1105_v11 = vadd.f32 %v1104_v6, %v1103_v53  ;;  %v1148_v12 = vrot.slane %v1147_v7, 1  ;;  %1396 = vmatpush.bf16.msrb.mxu2 %v1976_v2 }
 0x20b   : > { %v1090_v14 = vadd.f32 %v1089_v8, %v1088_v56  ;;  %v1133_v10 = vrot.slane %v1132_v9, 2  ;;  %1424 = vmatpush.bf16.msrb.mxu3 %v1985_v44  ;;  %v1983_v56 = vld [vmem:[#allocation7 + $0x40] sm:$0xff] }
 0x20c   : > { %v2862_v20 = vmul.f32 0.015625, %v1105_v11  ;;  %v1149_v24 = vadd.f32 %v1148_v12, %v1147_v7 }
 0x20d   : > { %v1091_v54 = vrot.slane %v1090_v14, 1  ;;  %v1134_v47 = vadd.f32 %v1133_v10, %v1132_v9 }
 0x20e   : > { %v1151_v21 = vmul.f32 0.015625, %v1149_v24  ;;  %v1153_v28 = vmul.f32 %v2862_v20, %v2862_v20  ;;  %1397 = vmatpush.bf16.msrb.mxu2 %v1975_v55 }
 0x20f   : > { %v1092_v15 = vadd.f32 %v1091_v54, %v1090_v14  ;;  %v1135_v22 = vrot.slane %v1134_v47, 1  ;;  %1425 = vmatpush.bf16.msrb.mxu3 %v1984_v3  ;;  %v794_v14 = vld [vmem:[#allocation5] sm:$0x3] }
 0x210   : > { %v1155_v27 = vsub.f32 %v1151_v21, %v1153_v28  ;;  %v795_v21 = vld [vmem:[%s2975_s6] sm:$0x3] }
 0x211   : > { %v1106_v29 = vmul.f32 0.015625, %v1092_v15  ;;  %v1136_v19 = vadd.f32 %v1135_v22, %v1134_v47 }
 0x212   : > { %v1157_v30 = vmax.f32 %v1155_v27, 0.0 }
 0x213   : > { %v1150_v31 = vmul.f32 0.015625, %v1136_v19  ;;  %v1152_v32 = vmul.f32 %v1106_v29, %v1106_v29  ;;  %1426 = vmatpush.bf16.msrb.mxu3 %v1983_v56 }
 0x214   : > { %v1159_v35 = vadd.f32 1e-05, %v1157_v30 }
 0x215   : > { %v1154_v60 = vsub.f32 %v1150_v31, %v1152_v32 }
 0x216   : > { %2082 = vrsqrt.f32 %v1159_v35  ;;  %vm1176_vm8 = vweird.f32 %v1159_v35 }
 0x217   : > { %v1156_v36 = vmax.f32 %v1154_v60, 0.0 }
 0x219   : > { %v1158_v42 = vadd.f32 1e-05, %v1156_v36 }
 0x21b   : > { %2084 = vrsqrt.f32 %v1158_v42  ;;  %vm1166_vm11 = vweird.f32 %v1158_v42 }
 0x21c   : > { %v2083_v0 = vpop.eup %2082 }
 0x21d   : > { %v1171_v1 = vmul.f32 %v2083_v0, %v1159_v35  ;;  %vm1177_vm7 = vweird.f32 %v2083_v0 }
 0x21e   : > { %vm1178_vm9 = vmor %vm1176_vm8, %vm1177_vm7 }
 0x21f   : > { %v1172_v49 = vmul.f32 %v2083_v0, %v1171_v1 }
 0x221   : > { %v2085_v51 = vpop.eup %2084  ;;  %v1173_v53 = vmul.f32 0.5, %v1172_v49 }
 0x222   : > { %v1161_v58 = vmul.f32 %v2085_v51, %v1158_v42  ;;  %vm1167_vm10 = vweird.f32 %v2085_v51 }
 0x223   : > { %v1174_v59 = vsub.f32 1.5, %v1173_v53  ;;  %vm1168_vm12 = vmor %vm1166_vm11, %vm1167_vm10 }
 0x224   : > { %v1162_v4 = vmul.f32 %v2085_v51, %v1161_v58 }
 0x225   : > { %v1175_v6 = vmul.f32 %v2083_v0, %v1174_v59 }
 0x226   : > { %v1163_v7 = vmul.f32 0.5, %v1162_v4 }
 0x227   : > { %v1179_v8 = vsel %vm1178_vm9, %v2083_v0, %v1175_v6 }
 0x228   : > { %v1164_v9 = vsub.f32 1.5, %v1163_v7  ;;  %v1182_v12 = vrot.slane %v1179_v8, 7 }
 0x22a   : > { %v1165_v11 = vmul.f32 %v2085_v51, %v1164_v9 }
 0x22c   : > { %v1169_v10 = vsel %vm1168_vm12, %v2085_v51, %v1165_v11 }
 0x22d   : > { %v1183_v17 = vsel %vm692_vm5, %v1169_v10, %v1182_v12 }
 0x22e   : > { %v1185_v18 = vmul.f32 %v1183_v17, %v794_v14 }
 0x230   : > { %v1187_v24 = vperm.slane %v1185_v18, 0  ;;  %v1188_v54 = vperm.slane %v1185_v18, 1 }
 0x232   : > { %v1192_v47 = vmul.f32 %v1188_v54, %v2862_v20  ;;  %v1191_v28 = vmul.f32 %v1187_v24, %v1106_v29  ;;  %v1199_v25 = vmul.f32 %v1187_v24, %v2802_v46  ;;  %v1201_v27 = vmul.f32 %v1187_v24, %v2792_v41 }
 0x233   : > { %v1200_v31 = vmul.f32 %v1188_v54, %v2784_v62  ;;  %v1202_v32 = vmul.f32 %v1188_v54, %v2782_v61  ;;  %v1213_v39 = vmul.f32 %v1187_v24, %v2857_v40  ;;  %v1211_v41 = vmul.f32 %v1187_v24, %v2842_v13 }
 0x234   : > { %v1195_v15 = vrot.slane %v1192_v47, 7  ;;  %v1212_v43 = vmul.f32 %v1188_v54, %v2818_v57  ;;  %v1214_v62 = vmul.f32 %v1188_v54, %v2845_v23  ;;  %v1203_v49 = vmul.f32 %v1187_v24, %v2804_v48 }
 0x235   : > { %v1205_v53 = vmul.f32 %v1187_v24, %v2813_v52  ;;  %v1204_v13 = vmul.f32 %v1188_v54, %v2786_v63  ;;  %v1206_v57 = vmul.f32 %v1188_v54, %v2790_v38  ;;  %v1207_v52 = vmul.f32 %v1187_v24, %v2826_v5 }
 0x236   : > { %v1196_v22 = vsel %vm692_vm5, %v1191_v28, %v1195_v15  ;;  %v1209_v63 = vmul.f32 %v1187_v24, %v2834_v16  ;;  %v1208_v38 = vmul.f32 %v1188_v54, %v2800_v45  ;;  %v1210_v12 = vmul.f32 %v1188_v54, %v2809_v50 }
 0x237   : > { %v1198_v26 = vsub.f32 %v795_v21, %v1196_v22 }
 0x239   : > { %v1216_v19 = vperm.slane %v1198_v26, 0  ;;  %v1217_v30 = vperm.slane %v1198_v26, 1 }
 0x23b   : > { %v1220_v20 = vadd.f32 %v1216_v19, %v1199_v25  ;;  %v1222_v33 = vadd.f32 %v1216_v19, %v1201_v27  ;;  %v1221_v34 = vadd.f32 %v1217_v30, %v1200_v31  ;;  %v1223_v35 = vadd.f32 %v1217_v30, %v1202_v32 }
 0x23c   : > { %v1232_v61 = vadd.f32 %v1216_v19, %v1211_v41  ;;  %v1234_v44 = vadd.f32 %v1216_v19, %v1213_v39  ;;  %v1233_v0 = vadd.f32 %v1217_v30, %v1212_v43  ;;  %v1235_v1 = vadd.f32 %v1217_v30, %v1214_v62 }
 0x23d   : > { %v1236_v60 = vmax.f32 %v1220_v20, 0.0  ;;  %v1238_v29 = vmax.f32 %v1222_v33, 0.0  ;;  %v1237_v36 = vmax.f32 %v1221_v34, 0.0  ;;  %v1239_v37 = vmax.f32 %v1223_v35, 0.0 }
 0x23e   : > { %v1248_v2 = vmax.f32 %v1232_v61, 0.0  ;;  %v1250_v3 = vmax.f32 %v1234_v44, 0.0  ;;  %v1249_v51 = vmax.f32 %v1233_v0, 0.0  ;;  %v1251_v40 = vmax.f32 %v1235_v1, 0.0 }
 0x23f   : > { %v1286_v42 = vpack.c.bf16 %v1238_v29, %v1236_v60  ;;  %v1287_v46 = vpack.c.bf16 %v1239_v37, %v1237_v36  ;;  %v1224_v56 = vadd.f32 %v1216_v19, %v1203_v49  ;;  %v1226_v58 = vadd.f32 %v1216_v19, %v1205_v53 }
 0x240   : > { %v1292_v55 = vpack.c.bf16 %v1250_v3, %v1248_v2  ;;  %v1293_v23 = vpack.c.bf16 %v1251_v40, %v1249_v51  ;;  %v1225_v59 = vadd.f32 %v1217_v30, %v1204_v13  ;;  %v1227_v4 = vadd.f32 %v1217_v30, %v1206_v57 }
 0x241   : > { %1398 = vmatmul.bf16.vlgmr.msrb.gmra.mxu2 %v1286_v42  ;;  %1427 = vmatmul.bf16.vlgmr.msrb.gmra.mxu3 %v1287_v46  ;;  %v1240_v6 = vmax.f32 %v1224_v56, 0.0  ;;  %v1242_v7 = vmax.f32 %v1226_v58, 0.0  ;;  %v1228_v14 = vadd.f32 %v1216_v19, %v1207_v52  ;;  %v1230_v10 = vadd.f32 %v1216_v19, %v1209_v63 }
 0x242   : > { %v1241_v8 = vmax.f32 %v1225_v59, 0.0  ;;  %v1243_v9 = vmax.f32 %v1227_v4, 0.0  ;;  %v1229_v17 = vadd.f32 %v1217_v30, %v1208_v38  ;;  %v1231_v18 = vadd.f32 %v1217_v30, %v1210_v12 }
 0x243   : > { %v1288_v11 = vpack.c.bf16 %v1242_v7, %v1240_v6  ;;  %v1244_v47 = vmax.f32 %v1228_v14, 0.0  ;;  %v1246_v21 = vmax.f32 %v1230_v10, 0.0 }
 0x244   : > { %v1289_v48 = vpack.c.bf16 %v1243_v9, %v1241_v8  ;;  %v1245_v28 = vmax.f32 %v1229_v17, 0.0  ;;  %v1247_v15 = vmax.f32 %v1231_v18, 0.0 }
 0x245   : > { %v1290_v22 = vpack.c.bf16 %v1246_v21, %v1244_v47 }
 0x246   : > { %v1291_v26 = vpack.c.bf16 %v1247_v15, %v1245_v28 }
 0x251   : > { %1403 = vmatmul.bf16.gmra.mxu2 %v1288_v11  ;;  %1432 = vmatmul.bf16.gmra.mxu3 %v1289_v48 }
 0x261   : > { %1408 = vmatmul.bf16.gmra.mxu2 %v1290_v22  ;;  %1437 = vmatmul.bf16.gmra.mxu3 %v1291_v26 }
 0x271   : > { %1413 = vmatmul.bf16.gmra.mxu2 %v1292_v55  ;;  %1442 = vmatmul.bf16.gmra.mxu3 %v1293_v23 }
 0x2c4   : > { %v1399_v5 = vpop.f32.mrf.mxu2  ;;  %v1428_v16 = vpop.f32.mrf.mxu3 }
 0x2c5   : > { %v2890_v33 = vadd.f32 %v1428_v16, %v1399_v5 }
 0x2c7   : > { %v1462_v29 = vmul.f32 %v2890_v33, %v2890_v33 }
 0x2cc   : > { %v1401_v24 = vpop.f32.mrf.mxu2  ;;  %v1430_v45 = vpop.f32.mrf.mxu3 }
 0x2cd   : > { %v2888_v20 = vadd.f32 %v1430_v45, %v1401_v24 }
 0x2cf   : > { %v1463_v35 = vmul.f32 %v2888_v20, %v2888_v20  ;;  %v1448_v36 = vadd.f32 %v2888_v20, %v2890_v33 }
 0x2d1   : > { %v1470_v41 = vadd.f32 %v1463_v35, %v1462_v29 }
 0x2d4   : > { %v1404_v25 = vpop.f32.mrf.mxu2  ;;  %v1433_v50 = vpop.f32.mrf.mxu3 }
 0x2d5   : > { %v2892_v34 = vadd.f32 %v1433_v50, %v1404_v25  ;;  %v1284_v50 = vld [vmem:[#allocation8] sm:$0x1] }
 0x2d7   : > { %v1464_v37 = vmul.f32 %v2892_v34, %v2892_v34  ;;  %v1449_v43 = vadd.f32 %v1448_v36, %v2892_v34 }
 0x2d9   : > { %v1471_v44 = vadd.f32 %v1470_v41, %v1464_v37 }
 0x2dc   : > { %v1406_v54 = vpop.f32.mrf.mxu2  ;;  %v1435_v27 = vpop.f32.mrf.mxu3 }
 0x2dd   : > { %v2896_v60 = vadd.f32 %v1435_v27, %v1406_v54 }
 0x2df   : > { %v1465_v62 = vmul.f32 %v2896_v60, %v2896_v60  ;;  %v1450_v0 = vadd.f32 %v1449_v43, %v2896_v60 }
 0x2e1   : > { %v1472_v3 = vadd.f32 %v1471_v44, %v1465_v62 }
 0x2e4   : > { %v1409_v19 = vpop.f32.mrf.mxu2  ;;  %v1438_v30 = vpop.f32.mrf.mxu3 }
 0x2e5   : > { %v2904_v39 = vadd.f32 %v1438_v30, %v1409_v19  ;;  %v1285_v30 = vld [vmem:[%s2978_s9] sm:$0x1] }
 0x2e7   : > { %v1466_v1 = vmul.f32 %v2904_v39, %v2904_v39  ;;  %v1451_v49 = vadd.f32 %v1450_v0, %v2904_v39 }
 0x2e9   : > { %v1473_v40 = vadd.f32 %v1472_v3, %v1466_v1 }
 0x2ec   : > { %v1411_v31 = vpop.f32.mrf.mxu2  ;;  %v1440_v32 = vpop.f32.mrf.mxu3 }
 0x2ed   : > { %v2909_v61 = vadd.f32 %v1440_v32, %v1411_v31 }
 0x2ef   : > { %v1467_v51 = vmul.f32 %v2909_v61, %v2909_v61  ;;  %v1452_v53 = vadd.f32 %v1451_v49, %v2909_v61 }
 0x2f1   : > { %v1474_v23 = vadd.f32 %v1473_v40, %v1467_v51 }
 0x2f4   : > { %v1414_v42 = vpop.f32.mrf.mxu2  ;;  %v1443_v46 = vpop.f32.mrf.mxu3 }
 0x2f5   : > { %v2914_v2 = vadd.f32 %v1443_v46, %v1414_v42 }
 0x2f7   : > { %v1468_v13 = vmul.f32 %v2914_v2, %v2914_v2  ;;  %v1453_v56 = vadd.f32 %v1452_v53, %v2914_v2 }
 0x2f9   : > { %v1475_v59 = vadd.f32 %v1474_v23, %v1468_v13 }
 0x2fc   : > { %v1416_v57 = vpop.f32.mrf.mxu2  ;;  %v1445_v55 = vpop.f32.mrf.mxu3 }
 0x2fd   : > { %v1446_v58 = vadd.f32 %v1445_v55, %v1416_v57 }
 0x2ff   : > { %v1454_v4 = vadd.f32 %v1453_v56, %v1446_v58  ;;  %v1469_v6 = vmul.f32 %v1446_v58, %v1446_v58 }
 0x301   : > { %v1455_v7 = vrot.slane %v1454_v4, 4  ;;  %v1476_v8 = vadd.f32 %v1475_v59, %v1469_v6 }
 0x303   : > { %v1456_v9 = vadd.f32 %v1455_v7, %v1454_v4  ;;  %v1477_v11 = vrot.slane %v1476_v8, 4 }
 0x305   : > { %v1457_v48 = vrot.slane %v1456_v9, 2  ;;  %v1478_v52 = vadd.f32 %v1477_v11, %v1476_v8 }
 0x307   : > { %v1458_v63 = vadd.f32 %v1457_v48, %v1456_v9  ;;  %v1479_v38 = vrot.slane %v1478_v52, 2 }
 0x309   : > { %v1459_v12 = vrot.slane %v1458_v63, 1  ;;  %v1480_v14 = vadd.f32 %v1479_v38, %v1478_v52 }
 0x30b   : > { %v1460_v10 = vadd.f32 %v1459_v12, %v1458_v63  ;;  %v1481_v17 = vrot.slane %v1480_v14, 1 }
 0x30d   : > { %v1461_v18 = vmul.f32 0.015625, %v1460_v10  ;;  %v1482_v47 = vadd.f32 %v1481_v17, %v1480_v14 }
 0x30f   : > { %v1483_v21 = vmul.f32 0.015625, %v1482_v47  ;;  %v1484_v28 = vmul.f32 %v1461_v18, %v1461_v18 }
 0x311   : > { %v1485_v15 = vsub.f32 %v1483_v21, %v1484_v28 }
 0x313   : > { %v1486_v22 = vmax.f32 %v1485_v15, 0.0 }
 0x315   : > { %v1487_v26 = vadd.f32 1e-05, %v1486_v22 }
 0x317   : > { %2086 = vrsqrt.f32 %v1487_v26  ;;  %vm1494_vm14 = vweird.f32 %v1487_v26 }
 0x31d   : > { %v2087_v5 = vpop.eup %2086 }
 0x31e   : > { %v1489_v16 = vmul.f32 %v2087_v5, %v1487_v26  ;;  %vm1495_vm13 = vweird.f32 %v2087_v5 }
 0x31f   : > { %vm1496_vm15 = vmor %vm1494_vm14, %vm1495_vm13 }
 0x320   : > { %v1490_v24 = vmul.f32 %v2087_v5, %v1489_v16 }
 0x322   : > { %v1491_v45 = vmul.f32 0.5, %v1490_v24 }
 0x324   : > { %v1492_v25 = vsub.f32 1.5, %v1491_v45 }
 0x326   : > { %v1493_v54 = vmul.f32 %v2087_v5, %v1492_v25 }
 0x328   : > { %v1497_v27 = vsel %vm1496_vm15, %v2087_v5, %v1493_v54 }
 0x329   : > { %v1498_v19 = vmul.f32 %v1497_v27, %v1284_v50 }
 0x32b   : > { %v1499_v31 = vmul.f32 %v1498_v19, %v1461_v18  ;;  %v1502_v32 = vperm.slane %v1498_v19, 0 }
 0x32d   : > { %v1500_v35 = vsub.f32 %v1285_v30, %v1499_v31  ;;  %v1504_v29 = vmul.f32 %v1502_v32, %v2890_v33  ;;  %v1505_v36 = vmul.f32 %v1502_v32, %v2888_v20  ;;  %v1506_v42 = vmul.f32 %v1502_v32, %v2892_v34 }
 0x32e   : > { %v1511_v46 = vmul.f32 %v1502_v32, %v1446_v58  ;;  %v1507_v41 = vmul.f32 %v1502_v32, %v2896_v60  ;;  %v1508_v44 = vmul.f32 %v1502_v32, %v2904_v39  ;;  %v1509_v33 = vmul.f32 %v1502_v32, %v2909_v61 }
 0x32f   : > { %v1513_v37 = vperm.slane %v1500_v35, 0  ;;  %v1510_v20 = vmul.f32 %v1502_v32, %v2914_v2 }
 0x331   : > { %v1515_v43 = vadd.f32 %v1513_v37, %v1504_v29  ;;  %v1516_v62 = vadd.f32 %v1513_v37, %v1505_v36  ;;  %v1517_v0 = vadd.f32 %v1513_v37, %v1506_v42  ;;  %v1522_v1 = vadd.f32 %v1513_v37, %v1511_v46 }
 0x332   : > { %v1518_v3 = vadd.f32 %v1513_v37, %v1507_v41  ;;  %v1519_v34 = vadd.f32 %v1513_v37, %v1508_v44  ;;  %v1520_v60 = vadd.f32 %v1513_v37, %v1509_v33  ;;  %v1521_v49 = vadd.f32 %v1513_v37, %v1510_v20 }
 0x333   : > { %1523 = vst [vmem:[%s415_s17] sm:$0xff] %v1515_v43 }
 0x334   : > { %1530 = vst [vmem:[%s415_s17 + $0x38] sm:$0xff] %v1522_v1 }
 0x335   : > { %1524 = vst [vmem:[%s415_s17 + $0x8] sm:$0xff] %v1516_v62 }
 0x336   : > { %1525 = vst [vmem:[%s415_s17 + $0x10] sm:$0xff] %v1517_v0 }
 0x337   : > { %1526 = vst [vmem:[%s415_s17 + $0x18] sm:$0xff] %v1518_v3 }
 0x338   : > { %1527 = vst [vmem:[%s415_s17 + $0x20] sm:$0xff] %v1519_v34 }
 0x339   : > { %1528 = vst [vmem:[%s415_s17 + $0x28] sm:$0xff] %v1520_v60 }
 0x33a   : > { %1529 = vst [vmem:[%s415_s17 + $0x30] sm:$0xff] %v1521_v49 }
 0x33b   : > { %2235 = shalt.err (!%p2232_p8)
}
 0x33c   : > { %s2292_s11 = smov 128   ;;  %s2293_s12 = smov 8  }
 0x33d   : > { %2008 = dma.vmem_to_hbm [thread:$0]  (%p2387_p5), %s1545_s15, 1024, %s1547_s19, %s1532_s22, %s2292_s11, %s2292_s11, %s2293_s12  }
 0x33e PF: > { %s2998_s21 = sld [smem:[#allocation15_spill]]  ;;  %p2035_p9 = scmp.ge.s32.totalorder %s2282_s16, 2 }
 0x340   : > { %p2024_p10 = pnand %p2035_p9, %p2391_p6 }
 0x342   : > { %p2025_p11 = pneg %p2024_p10 }
 0x344   : > { %s1561_s30 = sand.u32 1, %s2998_s21  }
 0x345   : > { %s1562_s1 = scalar_lea.sflag [#allocation4], %s1561_s30 }
 0x346   : > { %2265 = dma.done.wait (%p2025_p11), %s1562_s1, 1024  }
 0x347   : > { %2267 = vsyncadd (%p2025_p11), %s1562_s1, 4294966272  ;;  %s3000_s16 = sld [smem:[#allocation17_spill]]  ;;  %s3003_s13 = smov %s2274_s14 }
 0x348   : > { %s3001_s5 = sld [smem:[#allocation16_spill]] }
 0x349   : > { %s3002_s15 = sld [smem:[#allocation18_spill]] }
 0x34d   : > { %p23_p12 = scmp.ge.s32.totalorder %s3000_s16, 4  }
 0x34e   : > { %s3004_s14 = smov %s3001_s5 }
 0x34f   :  { %25 = sbr.rel (!%p23_p12) target bundleno = 9 (0x9), region = 112 }
 0x354   :  { %1568 = vsyncpa [#allocation3], 1 }
 0x355   :  { %1570 = vsyncpa [#allocation3 + $0x1], 1 }
 0x356   :  { %1571 = vsyncpa [#allocation6], 1 }
 0x357   :  { %1572 = vsyncpa [#allocation9], 1 }
 0x358   :  { %1573 = vsyncpa [#allocation4], 1 }
 0x359   :  { %1575 = vsyncpa [#allocation4 + $0x1], 1 }

</bundles_post_ra>
